<compile_context>
chip_gen: v6e
topology: v6e:2x2x1
jax: 0.10.0
libtpu: 0.0.40
codegen_flags: <defaults>
</compile_context>

<pallas_src>
import jax
import jax.numpy as jnp
import numpy as np
from jax.experimental import pallas as pl
from jax.experimental.pallas import tpu as pltpu

_HALF_LOG_2PI = 0.5 * float(np.log(2.0 * np.pi))


def _round_up(a, m):
    return ((a + m - 1) // m) * m


def _cond_logprob_kernel(x_ref, ctx_ref, w1_ref, b1_ref,
                         wmu_ref, bmu_ref, wls_ref, bls_ref, out_ref):
    """One batch tile, natural [batch, feature] layout (batch on sublanes)."""
    x = x_ref[...].astype(jnp.float32)                       # [tb, D] f32
    ctx = ctx_ref[...].astype(w1_ref.dtype)                  # [tb, C] matmul dtype

    # --- model_context MLP: Linear -> ReLU -> two heads (mean, log_std). MXU.
    h1 = jnp.dot(ctx, w1_ref[...],
                 preferred_element_type=jnp.float32) + b1_ref[...]       # [tb, H] f32
    h1 = jnp.maximum(h1, 0.0)                                            # ReLU (VPU)
    h1m = h1.astype(wmu_ref.dtype)
    mean = jnp.dot(h1m, wmu_ref[...],
                   preferred_element_type=jnp.float32) + bmu_ref[...]    # [tb, D] f32
    log_std = jnp.dot(h1m, wls_ref[...],
                      preferred_element_type=jnp.float32) + bls_ref[...] # [tb, D] f32

    # --- diagonal-Gaussian log_prob; elementwise math kept in f32 (VPU/EUP).
    z = (x - mean) * jnp.exp(-log_std)
    elem = -_HALF_LOG_2PI - log_std - 0.5 * z * z                        # [tb, D]
    # Cross-lane reduce over D -> [tb, 1] (small masked store, by design).
    out_ref[...] = jnp.sum(elem, axis=-1, keepdims=True)


def _num_tensorcores():
    """Best-effort megacore detection: v7x exposes 2 TensorCores per chip."""
    try:
        kind = jax.devices()[0].device_kind.lower()
    except Exception:
        return 1
    return 2 if ("v7" in kind or "7x" in kind) else 1


def _choose_batch_tile(B, num_cores, cap=4096):
    """Large VMEM batch tile (multiple of 128); split across cores on megacore only."""
    if num_cores <= 1 or B <= 128:
        return min(cap, _round_up(B, 128))
    steps = max(num_cores, pl.cdiv(B, cap))
    steps = _round_up(steps, num_cores)            # even split across the TCs
    return min(cap, _round_up(pl.cdiv(B, steps), 128))


def conditional_log_prob(x, context, params, *, batch_tile=None,
                         matmul_dtype=jnp.bfloat16, num_cores=None):
    """log_prob(x | context) == distribution.log_prob(x, model_context(context)).

    x: [B, D], context: [B, C]. Returns [B] f32.
    """
    x = jnp.asarray(x)
    context = jnp.asarray(context)
    B, D = x.shape
    Bc, C = context.shape
    assert Bc == B
    H = params["w1"].shape[1]

    if num_cores is None:
        num_cores = _num_tensorcores()
    if batch_tile is None:
        tb = _choose_batch_tile(B, num_cores)
    else:
        tb = min(_round_up(batch_tile, 128), _round_up(B, 128))
    grid = (pl.cdiv(B, tb),)        # partial last block allowed; no jnp.pad

    # --- weight/bias plumbing (KB-sized; cast once in the wrapper).
    # Biases stay f32 (added to f32 accumulators); matmul operands in matmul_dtype.
    w1 = params["w1"].astype(matmul_dtype)                      # [C, H]
    b1 = params["b1"].reshape(1, -1).astype(jnp.float32)        # [1, H]
    w_mu = params["w_mu"].astype(matmul_dtype)                  # [H, D]
    b_mu = params["b_mu"].reshape(1, -1).astype(jnp.float32)    # [1, D]
    w_ls = params["w_ls"].astype(matmul_dtype)                  # [H, D]
    b_ls = params["b_ls"].reshape(1, -1).astype(jnp.float32)    # [1, D]

    wbytes = jnp.dtype(matmul_dtype).itemsize
    cost = pl.CostEstimate(
        flops=2 * B * H * (C + 2 * D) + 8 * B * D,
        transcendentals=B * D,
        bytes_accessed=(B * D * jnp.dtype(x.dtype).itemsize
                        + B * C * jnp.dtype(context.dtype).itemsize
                        + 4 * B
                        + (C * H + 2 * H * D) * wbytes
                        + 4 * (H + 2 * D)),
    )

    out = pl.pallas_call(
        _cond_logprob_kernel,
        out_shape=jax.ShapeDtypeStruct((B, 1), jnp.float32),
        grid_spec=pltpu.PrefetchScalarGridSpec(
            num_scalar_prefetch=0,
            grid=grid,
            in_specs=[
                pl.BlockSpec((tb, D), lambda i: (i, 0)),     # x
                pl.BlockSpec((tb, C), lambda i: (i, 0)),     # context
                # Weights/biases: constant block index -> DMA'd once by Mosaic.
                # TODO(synk): pipeline_mode=pl.Buffered(1) would also drop their
                # redundant second VMEM buffer; skipped as a minor tweak.
                pl.BlockSpec((C, H), lambda i: (0, 0)),      # w1
                pl.BlockSpec((1, H), lambda i: (0, 0)),      # b1
                pl.BlockSpec((H, D), lambda i: (0, 0)),      # w_mu
                pl.BlockSpec((1, D), lambda i: (0, 0)),      # b_mu
                pl.BlockSpec((H, D), lambda i: (0, 0)),      # w_ls
                pl.BlockSpec((1, D), lambda i: (0, 0)),      # b_ls
            ],
            out_specs=pl.BlockSpec((tb, 1), lambda i: (i, 0)),
        ),
        compiler_params=pltpu.CompilerParams(
            dimension_semantics=("parallel",)),
        cost_estimate=cost,
    )(x, context, w1, b1, w_mu, b_mu, w_ls, b_ls)
    return out[:, 0]


def _reference_log_prob(x, context, params):
    h1 = jnp.maximum(context @ params["w1"] + params["b1"], 0.0)
    mean = h1 @ params["w_mu"] + params["b_mu"]
    log_std = h1 @ params["w_ls"] + params["b_ls"]
    z = (x - mean) * jnp.exp(-log_std)
    elem = -0.5 * jnp.log(2 * jnp.pi) - log_std - 0.5 * z * z
    return jnp.sum(elem, axis=-1)


def init_params(key, context_dim, hidden, feat_dim):
    k1, k2, k3 = jax.random.split(key, 3)
    scale = 0.1
    return {
        "w1":   scale * jax.random.normal(k1, (context_dim, hidden), jnp.float32),
        "b1":   jnp.zeros((1, hidden), jnp.float32),
        "w_mu": scale * jax.random.normal(k2, (hidden, feat_dim), jnp.float32),
        "b_mu": jnp.zeros((1, feat_dim), jnp.float32),
        "w_ls": scale * jax.random.normal(k3, (hidden, feat_dim), jnp.float32),
        "b_ls": jnp.zeros((1, feat_dim), jnp.float32),
    }


if __name__ == "__main__":
    key = jax.random.PRNGKey(0)
    kx, kc, kp = jax.random.split(key, 3)

    B, D, C, H = 256, 32, 16, 64        # batch, feature dim, context dim, hidden
    x = jax.random.normal(kx, (B, D), jnp.float32)
    context = jax.random.normal(kc, (B, C), jnp.float32)
    params = init_params(kp, C, H, D)

    ref = _reference_log_prob(x, context, params)

    # 1) Exact f32 matmul path (tight tolerance), auto tile selection.
    log_px = jax.block_until_ready(
        conditional_log_prob(x, context, params, matmul_dtype=jnp.float32))
    np.testing.assert_allclose(np.asarray(log_px), np.asarray(ref),
                               rtol=1e-5, atol=1e-4)

    # 2) Default bf16-matmul path (f32 accumulation) — looser tolerance.
    log_px_bf16 = jax.block_until_ready(conditional_log_prob(x, context, params))
    np.testing.assert_allclose(np.asarray(log_px_bf16), np.asarray(ref),
                               rtol=5e-3, atol=1e-1)

    # 3) Ragged batch -> partial last grid block (no jnp.pad), explicit tile.
    B2 = 200
    log_px2 = jax.block_until_ready(
        conditional_log_prob(x[:B2], context[:B2], params,
                             batch_tile=128, matmul_dtype=jnp.float32))
    np.testing.assert_allclose(np.asarray(log_px2), np.asarray(ref[:B2]),
                               rtol=1e-5, atol=1e-4)

    print("KERNEL_OK")
</pallas_src>

<mosaic_0001>
module attributes {stable_mosaic.version = 11 : i64} {
  func.func @_cond_logprob_kernel(%arg0: i32, %arg1: memref<256x32xf32, #tpu.memory_space<vmem>>, %arg2: memref<256x16xf32, #tpu.memory_space<vmem>>, %arg3: memref<16x64xf32, #tpu.memory_space<vmem>>, %arg4: memref<1x64xf32, #tpu.memory_space<vmem>>, %arg5: memref<64x32xf32, #tpu.memory_space<vmem>>, %arg6: memref<1x32xf32, #tpu.memory_space<vmem>>, %arg7: memref<64x32xf32, #tpu.memory_space<vmem>>, %arg8: memref<1x32xf32, #tpu.memory_space<vmem>>, %arg9: memref<256x1xf32, #tpu.memory_space<vmem>>) attributes {dimension_semantics = [#tpu.dimension_semantics<parallel>], iteration_bounds = array<i64: 1>, scalar_prefetch = 0 : i64, scratch_operands = 0 : i64, tpu.core_type = #tpu.core_type<tc>, window_params = [{transform_indices = @transform_0, window_bounds = array<i64: 256, 32>}, {transform_indices = @transform_1, window_bounds = array<i64: 256, 16>}, {pipeline_mode = #tpu.pipeline_mode<synchronous>, transform_indices = @transform_2, window_bounds = array<i64: 16, 64>}, {pipeline_mode = #tpu.pipeline_mode<synchronous>, transform_indices = @transform_3, window_bounds = array<i64: 1, 64>}, {pipeline_mode = #tpu.pipeline_mode<synchronous>, transform_indices = @transform_4, window_bounds = array<i64: 64, 32>}, {pipeline_mode = #tpu.pipeline_mode<synchronous>, transform_indices = @transform_5, window_bounds = array<i64: 1, 32>}, {pipeline_mode = #tpu.pipeline_mode<synchronous>, transform_indices = @transform_6, window_bounds = array<i64: 64, 32>}, {pipeline_mode = #tpu.pipeline_mode<synchronous>, transform_indices = @transform_7, window_bounds = array<i64: 1, 32>}, {transform_indices = @transform_8, window_bounds = array<i64: 256, 1>}]} {
    %c0 = arith.constant 0 : index
    %c0_0 = arith.constant 0 : index
    %0 = vector.load %arg1[%c0, %c0_0] : memref<256x32xf32, #tpu.memory_space<vmem>>, vector<256x32xf32>
    %c0_1 = arith.constant 0 : index
    %c0_2 = arith.constant 0 : index
    %1 = vector.load %arg2[%c0_1, %c0_2] : memref<256x16xf32, #tpu.memory_space<vmem>>, vector<256x16xf32>
    %c0_3 = arith.constant 0 : index
    %c0_4 = arith.constant 0 : index
    %2 = vector.load %arg3[%c0_3, %c0_4] : memref<16x64xf32, #tpu.memory_space<vmem>>, vector<16x64xf32>
    %cst = arith.constant dense<0.000000e+00> : vector<256x64xf32>
    %3 = tpu.matmul %1, %2, %cst {dimension_numbers = #tpu.dot_dimension_numbers<[1], [0], [0], [1], [0, 0, 1, 1], [], []>} : vector<256x16xf32>, vector<16x64xf32>, vector<256x64xf32> -> vector<256x64xf32>
    %c0_5 = arith.constant 0 : index
    %c0_6 = arith.constant 0 : index
    %4 = vector.load %arg4[%c0_5, %c0_6] : memref<1x64xf32, #tpu.memory_space<vmem>>, vector<1x64xf32>
    %5 = vector.broadcast %4 : vector<1x64xf32> to vector<256x64xf32>
    %6 = arith.addf %3, %5 : vector<256x64xf32>
    %cst_7 = arith.constant 0.000000e+00 : f32
    %7 = vector.broadcast %cst_7 : f32 to vector<256x64xf32>
    %8 = arith.maximumf %6, %7 : vector<256x64xf32>
    %c0_8 = arith.constant 0 : index
    %c0_9 = arith.constant 0 : index
    %9 = vector.load %arg5[%c0_8, %c0_9] : memref<64x32xf32, #tpu.memory_space<vmem>>, vector<64x32xf32>
    %cst_10 = arith.constant dense<0.000000e+00> : vector<256x32xf32>
    %10 = tpu.matmul %8, %9, %cst_10 {dimension_numbers = #tpu.dot_dimension_numbers<[1], [0], [0], [1], [0, 0, 1, 1], [], []>} : vector<256x64xf32>, vector<64x32xf32>, vector<256x32xf32> -> vector<256x32xf32>
    %c0_11 = arith.constant 0 : index
    %c0_12 = arith.constant 0 : index
    %11 = vector.load %arg6[%c0_11, %c0_12] : memref<1x32xf32, #tpu.memory_space<vmem>>, vector<1x32xf32>
    %12 = vector.broadcast %11 : vector<1x32xf32> to vector<256x32xf32>
    %13 = arith.addf %10, %12 : vector<256x32xf32>
    %c0_13 = arith.constant 0 : index
    %c0_14 = arith.constant 0 : index
    %14 = vector.load %arg7[%c0_13, %c0_14] : memref<64x32xf32, #tpu.memory_space<vmem>>, vector<64x32xf32>
    %cst_15 = arith.constant dense<0.000000e+00> : vector<256x32xf32>
    %15 = tpu.matmul %8, %14, %cst_15 {dimension_numbers = #tpu.dot_dimension_numbers<[1], [0], [0], [1], [0, 0, 1, 1], [], []>} : vector<256x64xf32>, vector<64x32xf32>, vector<256x32xf32> -> vector<256x32xf32>
    %c0_16 = arith.constant 0 : index
    %c0_17 = arith.constant 0 : index
    %16 = vector.load %arg8[%c0_16, %c0_17] : memref<1x32xf32, #tpu.memory_space<vmem>>, vector<1x32xf32>
    %17 = vector.broadcast %16 : vector<1x32xf32> to vector<256x32xf32>
    %18 = arith.addf %15, %17 : vector<256x32xf32>
    %19 = arith.subf %0, %13 : vector<256x32xf32>
    %cst_18 = arith.constant 0.000000e+00 : f32
    %20 = vector.broadcast %cst_18 : f32 to vector<256x32xf32>
    %21 = arith.subf %20, %18 : vector<256x32xf32>
    %22 = math.exp %21 : vector<256x32xf32>
    %23 = arith.mulf %19, %22 : vector<256x32xf32>
    %cst_19 = arith.constant -0.918938517 : f32
    %24 = vector.broadcast %cst_19 : f32 to vector<256x32xf32>
    %25 = arith.subf %24, %18 : vector<256x32xf32>
    %cst_20 = arith.constant 5.000000e-01 : f32
    %26 = vector.broadcast %cst_20 : f32 to vector<256x32xf32>
    %27 = arith.mulf %26, %23 : vector<256x32xf32>
    %28 = arith.mulf %27, %23 : vector<256x32xf32>
    %29 = arith.subf %25, %28 : vector<256x32xf32>
    %cst_21 = arith.constant dense<0.000000e+00> : vector<256xf32>
    %30 = vector.multi_reduction <add>, %29, %cst_21 [1] : vector<256x32xf32> to vector<256xf32>
    %31 = vector.shape_cast %30 : vector<256xf32> to vector<256x1xf32>
    %c0_22 = arith.constant 0 : index
    %c0_23 = arith.constant 0 : index
    %32 = vector.load %arg9[%c0_22, %c0_23] : memref<256x1xf32, #tpu.memory_space<vmem>>, vector<256x1xf32>
    tpu.vector_store %arg9[%c0_22, %c0_23], %31 {strides = array<i32>} : memref<256x1xf32, #tpu.memory_space<vmem>>, vector<256x1xf32>,
    return
  }
  func.func @transform_0(%arg0: i32) -> (i32, i32) {
    %c0_i32 = arith.constant 0 : i32
    %c0_i32_0 = arith.constant 0 : i32
    return %arg0, %c0_i32 : i32, i32
  }
  func.func @transform_1(%arg0: i32) -> (i32, i32) {
    %c0_i32 = arith.constant 0 : i32
    %c0_i32_0 = arith.constant 0 : i32
    return %arg0, %c0_i32 : i32, i32
  }
  func.func @transform_2(%arg0: i32) -> (i32, i32) {
    %c0_i32 = arith.constant 0 : i32
    %c0_i32_0 = arith.constant 0 : i32
    %c0_i32_1 = arith.constant 0 : i32
    return %c0_i32, %c0_i32_0 : i32, i32
  }
  func.func @transform_3(%arg0: i32) -> (i32, i32) {
    %c0_i32 = arith.constant 0 : i32
    %c0_i32_0 = arith.constant 0 : i32
    %c0_i32_1 = arith.constant 0 : i32
    return %c0_i32, %c0_i32_0 : i32, i32
  }
  func.func @transform_4(%arg0: i32) -> (i32, i32) {
    %c0_i32 = arith.constant 0 : i32
    %c0_i32_0 = arith.constant 0 : i32
    %c0_i32_1 = arith.constant 0 : i32
    return %c0_i32, %c0_i32_0 : i32, i32
  }
  func.func @transform_5(%arg0: i32) -> (i32, i32) {
    %c0_i32 = arith.constant 0 : i32
    %c0_i32_0 = arith.constant 0 : i32
    %c0_i32_1 = arith.constant 0 : i32
    return %c0_i32, %c0_i32_0 : i32, i32
  }
  func.func @transform_6(%arg0: i32) -> (i32, i32) {
    %c0_i32 = arith.constant 0 : i32
    %c0_i32_0 = arith.constant 0 : i32
    %c0_i32_1 = arith.constant 0 : i32
    return %c0_i32, %c0_i32_0 : i32, i32
  }
  func.func @transform_7(%arg0: i32) -> (i32, i32) {
    %c0_i32 = arith.constant 0 : i32
    %c0_i32_0 = arith.constant 0 : i32
    %c0_i32_1 = arith.constant 0 : i32
    return %c0_i32, %c0_i32_0 : i32, i32
  }
  func.func @transform_8(%arg0: i32) -> (i32, i32) {
    %c0_i32 = arith.constant 0 : i32
    %c0_i32_0 = arith.constant 0 : i32
    return %arg0, %c0_i32 : i32, i32
  }
}

</mosaic_0001>

<bundles_post_ra>
// kernel: tpu_custom_call.1
= control target key start
LH: loop header
LB: loop body
LE: loop exit
PB: predicated region body
PF: predicated region fallthrough
CT: control target
= control target key end

     0   :  { %vm102_vm0 = vcmask 130048   ;;  %vm471_vm1 = vcmask 523264   ;;  %vm1321_vm2 = vcmask 261120   ;;  %vm1418_vm3 = vcmask 7168   ;;  %s3051_s2 = inlined_call_operand.vmem [shape: f32[16,64], index: 2, kind: input, shape index: {}]   ;;  %s3052_s1 = inlined_call_operand.vmem [shape: f32[256,16], index: 1, kind: input, shape index: {}]   ;;  %s3053_s6 = inlined_call_operand.vmem [shape: f32[64,32], index: 6, kind: input, shape index: {}]   ;;  %s3054_s4 = inlined_call_operand.vmem [shape: f32[64,32], index: 4, kind: input, shape index: {}]   ;;  %s3055_s3 = inlined_call_operand.vmem [shape: f32[1,64], index: 3, kind: input, shape index: {}]   ;;  %s3056_s7 = inlined_call_operand.vmem [shape: f32[1,32], index: 7, kind: input, shape index: {}]   ;;  %s3057_s5 = inlined_call_operand.vmem [shape: f32[1,32], index: 5, kind: input, shape index: {}]   ;;  %s3058_s0 = inlined_call_operand.vmem [shape: f32[256,32], index: 0, kind: input, shape index: {}]   ;;  %s3059_s8 = inlined_call_operand.vmem [shape: f32[256,1], index: 8, kind: output, shape index: {}]  }
   0x1   :  { %v94_v0 = vld [vmem:[%s3051_s2 + $0x8] sm:$0xff]  ;;  %v93_v1 = vld [vmem:[%s3051_s2] sm:$0xff]  ;;  %v63_v4 = vld [vmem:[%s3052_s1 + $0x10] sm:$0xff] }
   0x2   :  { %v61_v2 = vld [vmem:[%s3052_s1] sm:$0xff]  ;;  %1668 = vmatprep.subr.mxu0 %v94_v0  ;;  %v62_v3 = vld [vmem:[%s3052_s1 + $0x8] sm:$0xff]  ;;  %1848 = vmatprep.subr.mxu1 %v94_v0  ;;  %v64_v5 = vld [vmem:[%s3052_s1 + $0x18] sm:$0xff] }
   0x3   :  { %1672 = vmatprep.mubr.msk.f32.mxu0 %vm102_vm0, %v61_v2  ;;  %1669 = vmatpush3.msra.mxu0 %v94_v0  ;;  %v77_v6 = vld [vmem:[%s3052_s1 + $0x80] sm:$0xff]  ;;  %v78_v7 = vld [vmem:[%s3052_s1 + $0x88] sm:$0xff]  ;;  %v79_v8 = vld [vmem:[%s3052_s1 + $0x90] sm:$0xff] }
   0x4   :  { %1670 = vmatprep.subr.mxu0 %v93_v1  ;;  %1850 = vmatpush3.msra.mxu1 %v94_v0  ;;  %v65_v9 = vld [vmem:[%s3052_s1 + $0x20] sm:$0xff]  ;;  %v80_v10 = vld [vmem:[%s3052_s1 + $0x98] sm:$0xff]  ;;  %v66_v11 = vld [vmem:[%s3052_s1 + $0x28] sm:$0xff] }
   0x5   :  { %1671 = vmatpush3.msra.mxu0 %v93_v1  ;;  %1849 = vmatprep.subr.mxu1 %v93_v1  ;;  %v81_v12 = vld [vmem:[%s3052_s1 + $0xa0] sm:$0xff]  ;;  %v67_v13 = vld [vmem:[%s3052_s1 + $0x30] sm:$0xff]  ;;  %v800_v14 = vld [vmem:[%s3053_s6 + $0x38] sm:$0xff] }
   0x6   :  { %1673 = vmatmul.mubr.msk.f32.vlgmr.msra.gmra.mxu0 %vm102_vm0, %v62_v3  ;;  %1851 = vmatpush3.msra.mxu1 %v93_v1  ;;  %v799_v15 = vld [vmem:[%s3053_s6 + $0x30] sm:$0xff]  ;;  %v463_v16 = vld [vmem:[%s3054_s4 + $0x38] sm:$0xff]  ;;  %v82_v17 = vld [vmem:[%s3052_s1 + $0xa8] sm:$0xff] }
   0x7   :  { %1675 = vmatprep.mubr.msk.f32.mxu0 %vm102_vm0, %v63_v4  ;;  %1696 = vmatprep.mubr.msk.f32.mxu1 %vm102_vm0, %v77_v6  ;;  %v68_v18 = vld [vmem:[%s3052_s1 + $0x38] sm:$0xff]  ;;  %v83_v19 = vld [vmem:[%s3052_s1 + $0xb0] sm:$0xff]  ;;  %v69_v20 = vld [vmem:[%s3052_s1 + $0x40] sm:$0xff] }
   0x8   :  { %1697 = vmatmul.mubr.msk.f32.vlgmr.msra.gmra.mxu1 %vm102_vm0, %v78_v7  ;;  %1784 = vmatprep.subr.mxu0 %v800_v14  ;;  %v798_v21 = vld [vmem:[%s3053_s6 + $0x28] sm:$0xff]  ;;  %v84_v22 = vld [vmem:[%s3052_s1 + $0xb8] sm:$0xff]  ;;  %v797_v23 = vld [vmem:[%s3053_s6 + $0x20] sm:$0xff] }
   0x9   :  { %1699 = vmatprep.mubr.msk.f32.mxu1 %vm102_vm0, %v79_v8  ;;  %1785 = vmatpush3.msra.mxu0 %v800_v14  ;;  %v70_v24 = vld [vmem:[%s3052_s1 + $0x48] sm:$0xff]  ;;  %v85_v25 = vld [vmem:[%s3052_s1 + $0xc0] sm:$0xff]  ;;  %v71_v26 = vld [vmem:[%s3052_s1 + $0x50] sm:$0xff] }
   0xa   :  { %1676 = vmatmul.mubr.msk.f32.gmra.mxu0 %vm102_vm0, %v64_v5  ;;  %1786 = vmatprep.subr.mxu0 %v799_v15  ;;  %v796_v27 = vld [vmem:[%s3053_s6 + $0x18] sm:$0xff]  ;;  %v462_v28 = vld [vmem:[%s3054_s4 + $0x30] sm:$0xff]  ;;  %v86_v29 = vld [vmem:[%s3052_s1 + $0xc8] sm:$0xff] }
   0xb   :  { %1678 = vmatprep.mubr.msk.f32.mxu0 %vm102_vm0, %v65_v9  ;;  %1720 = vmatprep.subr.mxu1 %v463_v16  ;;  %v72_v30 = vld [vmem:[%s3052_s1 + $0x58] sm:$0xff]  ;;  %v87_v31 = vld [vmem:[%s3052_s1 + $0xd0] sm:$0xff]  ;;  %v73_v32 = vld [vmem:[%s3052_s1 + $0x60] sm:$0xff] }
   0xc   :  { %1700 = vmatmul.mubr.msk.f32.gmra.mxu1 %vm102_vm0, %v80_v10  ;;  %1787 = vmatpush3.msra.mxu0 %v799_v15  ;;  %v795_v33 = vld [vmem:[%s3053_s6 + $0x10] sm:$0xff]  ;;  %v461_v34 = vld [vmem:[%s3054_s4 + $0x28] sm:$0xff]  ;;  %v88_v35 = vld [vmem:[%s3052_s1 + $0xd8] sm:$0xff] }
   0xd   :  { %1702 = vmatprep.mubr.msk.f32.mxu1 %vm102_vm0, %v81_v12  ;;  %1788 = vmatprep.subr.mxu0 %v798_v21  ;;  %v74_v36 = vld [vmem:[%s3052_s1 + $0x68] sm:$0xff]  ;;  %v89_v37 = vld [vmem:[%s3052_s1 + $0xe0] sm:$0xff]  ;;  %v75_v38 = vld [vmem:[%s3052_s1 + $0x70] sm:$0xff] }
   0xe   :  { %1679 = vmatmul.mubr.msk.f32.gmra.mxu0 %vm102_vm0, %v66_v11  ;;  %1721 = vmatpush3.msra.mxu1 %v463_v16  ;;  %v460_v39 = vld [vmem:[%s3054_s4 + $0x20] sm:$0xff]  ;;  %v794_v40 = vld [vmem:[%s3053_s6 + $0x8] sm:$0xff]  ;;  %v76_v42 = vld [vmem:[%s3052_s1 + $0x78] sm:$0xff] }
   0xf   :  { %1681 = vmatprep.mubr.msk.f32.mxu0 %vm102_vm0, %v67_v13  ;;  %1789 = vmatpush3.msra.mxu0 %v798_v21  ;;  %v90_v41 = vld [vmem:[%s3052_s1 + $0xe8] sm:$0xff]  ;;  %v91_v43 = vld [vmem:[%s3052_s1 + $0xf0] sm:$0xff]  ;;  %v92_v44 = vld [vmem:[%s3052_s1 + $0xf8] sm:$0xff] }
  0x10   :  { %1703 = vmatmul.mubr.msk.f32.gmra.mxu1 %vm102_vm0, %v82_v17  ;;  %1790 = vmatprep.subr.mxu0 %v797_v23  ;;  %v459_v45 = vld [vmem:[%s3054_s4 + $0x18] sm:$0xff]  ;;  %v458_v46 = vld [vmem:[%s3054_s4 + $0x10] sm:$0xff]  ;;  %v457_v47 = vld [vmem:[%s3054_s4 + $0x8] sm:$0xff] }
  0x11   :  { %1705 = vmatprep.mubr.msk.f32.mxu1 %vm102_vm0, %v83_v19  ;;  %1791 = vmatpush3.msra.mxu0 %v797_v23  ;;  %v793_v48 = vld [vmem:[%s3053_s6] sm:$0xff] }
  0x12   :  { %1682 = vmatmul.mubr.msk.f32.gmra.mxu0 %vm102_vm0, %v68_v18  ;;  %1792 = vmatprep.subr.mxu0 %v796_v27  ;;  %v456_v49 = vld [vmem:[%s3054_s4] sm:$0xff] }
  0x13   :  { %1684 = vmatprep.mubr.msk.f32.mxu0 %vm102_vm0, %v69_v20  ;;  %1722 = vmatprep.subr.mxu1 %v462_v28  ;;  %v2146_v50 = vld [vmem:[%s3055_s3] ss:$0 sm:$0xff] }
  0x14   :  { %1706 = vmatmul.mubr.msk.f32.gmra.mxu1 %vm102_vm0, %v84_v22  ;;  %1793 = vmatpush3.msra.mxu0 %v796_v27 }
  0x15   :  { %1708 = vmatprep.mubr.msk.f32.mxu1 %vm102_vm0, %v85_v25  ;;  %1723 = vmatpush3.msra.mxu1 %v462_v28 }
  0x16   :  { %1685 = vmatmul.mubr.msk.f32.gmra.mxu0 %vm102_vm0, %v70_v24  ;;  %1794 = vmatprep.subr.mxu0 %v795_v33 }
  0x17   :  { %1687 = vmatprep.mubr.msk.f32.mxu0 %vm102_vm0, %v71_v26  ;;  %1724 = vmatprep.subr.mxu1 %v461_v34 }
  0x18   :  { %1709 = vmatmul.mubr.msk.f32.gmra.mxu1 %vm102_vm0, %v86_v29  ;;  %1795 = vmatpush3.msra.mxu0 %v795_v33 }
  0x19   :  { %1711 = vmatprep.mubr.msk.f32.mxu1 %vm102_vm0, %v87_v31  ;;  %1725 = vmatpush3.msra.mxu1 %v461_v34 }
  0x1a   :  { %1688 = vmatmul.mubr.msk.f32.gmra.mxu0 %vm102_vm0, %v72_v30  ;;  %1726 = vmatprep.subr.mxu1 %v460_v39 }
  0x1b   :  { %1690 = vmatprep.mubr.msk.f32.mxu0 %vm102_vm0, %v73_v32  ;;  %1796 = vmatprep.subr.mxu0 %v794_v40 }
  0x1c   :  { %1712 = vmatmul.mubr.msk.f32.gmra.mxu1 %vm102_vm0, %v88_v35  ;;  %1797 = vmatpush3.msra.mxu0 %v794_v40 }
  0x1d   :  { %1714 = vmatprep.mubr.msk.f32.mxu1 %vm102_vm0, %v89_v37  ;;  %1727 = vmatpush3.msra.mxu1 %v460_v39 }
  0x1e   :  { %1691 = vmatmul.mubr.msk.f32.gmra.mxu0 %vm102_vm0, %v74_v36  ;;  %1728 = vmatprep.subr.mxu1 %v459_v45 }
  0x1f   :  { %1693 = vmatprep.mubr.msk.f32.mxu0 %vm102_vm0, %v75_v38  ;;  %1729 = vmatpush3.msra.mxu1 %v459_v45 }
  0x20   :  { %1715 = vmatmul.mubr.msk.f32.gmra.mxu1 %vm102_vm0, %v90_v41  ;;  %1730 = vmatprep.subr.mxu1 %v458_v46 }
  0x21   :  { %1717 = vmatprep.mubr.msk.f32.mxu1 %vm102_vm0, %v91_v43  ;;  %1731 = vmatpush3.msra.mxu1 %v458_v46 }
  0x22   :  { %1694 = vmatmul.mubr.msk.f32.gmra.mxu0 %vm102_vm0, %v76_v42  ;;  %1732 = vmatprep.subr.mxu1 %v457_v47 }
  0x23   :  { %1733 = vmatpush3.msra.mxu1 %v457_v47  ;;  %1798 = vmatprep.subr.mxu0 %v793_v48 }
  0x24   :  { %1718 = vmatmul.mubr.msk.f32.gmra.mxu1 %vm102_vm0, %v92_v44  ;;  %1734 = vmatprep.subr.mxu1 %v456_v49 }
  0x25   :  { %1799 = vmatpush3.msra.mxu0 %v793_v48  ;;  %1735 = vmatpush3.msra.mxu1 %v456_v49 }
  0xc6   :  { %v1674_v51 = vpop.f32.mrf.mxu0 }
  0xc7   :  { %v271_v52 = vadd.f32 %v1674_v51, %v2146_v50 }
  0xc8   :  { %v265_v53 = vpop.f32.mrf.mxu0  ;;  %v2150_v55 = vpop.f32.mrf.mxu1 }
  0xc9   :  { %v266_v54 = vadd.f32 %v2146_v50, %v265_v53  ;;  %v425_v59 = vmax.f32 %v271_v52, 0.0  ;;  %v351_v45 = vadd.f32 %v2150_v55, %v2146_v50 }
  0xca   :  { %v1677_v56 = vpop.f32.mrf.mxu0  ;;  %v2152_v58 = vpop.f32.mrf.mxu1 }
  0xcb   :  { %v424_v57 = vmax.f32 %v266_v54, 0.0  ;;  %v281_v60 = vadd.f32 %v1677_v56, %v2146_v50  ;;  %v346_v40 = vadd.f32 %v2146_v50, %v2152_v58  ;;  %v441_v51 = vmax.f32 %v351_v45, 0.0 }
  0xcc   :  { %v275_v61 = vpop.f32.mrf.mxu0  ;;  %v2158_v63 = vpop.f32.mrf.mxu1 }
  0xcd   :  { %v276_v62 = vadd.f32 %v2146_v50, %v275_v61  ;;  %1736 = vmatprep.mubr.msk.f32.mxu1 %vm471_vm1, %v424_v57  ;;  %1800 = vmatprep.mubr.msk.f32.mxu0 %vm471_vm1, %v424_v57  ;;  %v427_v4 = vmax.f32 %v281_v60, 0.0  ;;  %v440_v47 = vmax.f32 %v346_v40, 0.0  ;;  %v361_v52 = vadd.f32 %v2158_v63, %v2146_v50 }
  0xce   :  { %v1680_v0 = vpop.f32.mrf.mxu0  ;;  %1737 = vmatmul.mubr.msk.f32.vlgmr.msra.gmra.mxu1 %vm471_vm1, %v425_v59  ;;  %1801 = vmatmul.mubr.msk.f32.vlgmr.msra.gmra.mxu0 %vm471_vm1, %v425_v59  ;;  %v2163_v3 = vpop.f32.mrf.mxu1 }
  0xcf   :  { %v426_v1 = vmax.f32 %v276_v62, 0.0  ;;  %v291_v2 = vadd.f32 %v1680_v0, %v2146_v50  ;;  %v356_v48 = vadd.f32 %v2146_v50, %v2163_v3  ;;  %v443_v56 = vmax.f32 %v361_v52, 0.0 }
  0xd0   :  { %v285_v5 = vpop.f32.mrf.mxu0  ;;  %v2168_v7 = vpop.f32.mrf.mxu1 }
  0xd1   :  { %v286_v6 = vadd.f32 %v2146_v50, %v285_v5  ;;  %1739 = vmatprep.mubr.msk.f32.mxu1 %vm471_vm1, %v426_v1  ;;  %1803 = vmatprep.mubr.msk.f32.mxu0 %vm471_vm1, %v426_v1  ;;  %v429_v8 = vmax.f32 %v291_v2, 0.0  ;;  %v442_v53 = vmax.f32 %v356_v48, 0.0  ;;  %v371_v57 = vadd.f32 %v2168_v7, %v2146_v50 }
  0xd2   :  { %v1683_v9 = vpop.f32.mrf.mxu0  ;;  %1740 = vmatmul.mubr.msk.f32.gmra.mxu1 %vm471_vm1, %v427_v4  ;;  %1804 = vmatmul.mubr.msk.f32.gmra.mxu0 %vm471_vm1, %v427_v4  ;;  %v2173_v13 = vpop.f32.mrf.mxu1 }
  0xd3   :  { %v428_v10 = vmax.f32 %v286_v6, 0.0  ;;  %v301_v11 = vadd.f32 %v1683_v9, %v2146_v50  ;;  %v366_v54 = vadd.f32 %v2146_v50, %v2173_v13  ;;  %v445_v61 = vmax.f32 %v371_v57, 0.0 }
  0xd4   :  { %v295_v12 = vpop.f32.mrf.mxu0  ;;  %v2181_v20 = vpop.f32.mrf.mxu1 }
  0xd5   :  { %v296_v14 = vadd.f32 %v2146_v50, %v295_v12  ;;  %1742 = vmatprep.mubr.msk.f32.mxu1 %vm471_vm1, %v428_v10  ;;  %1806 = vmatprep.mubr.msk.f32.mxu0 %vm471_vm1, %v428_v10  ;;  %v431_v15 = vmax.f32 %v301_v11, 0.0  ;;  %v444_v58 = vmax.f32 %v366_v54, 0.0  ;;  %v381_v62 = vadd.f32 %v2181_v20, %v2146_v50  ;;  %v2315_v54 = vld [vmem:[%s3058_s0 + $0x18] sm:$0xff] }
  0xd6   :  { %v1686_v16 = vpop.f32.mrf.mxu0  ;;  %1743 = vmatmul.mubr.msk.f32.gmra.mxu1 %vm471_vm1, %v429_v8  ;;  %1807 = vmatmul.mubr.msk.f32.gmra.mxu0 %vm471_vm1, %v429_v8  ;;  %v375_v27 = vpop.f32.mrf.mxu1 }
  0xd7   :  { %v430_v17 = vmax.f32 %v296_v14, 0.0  ;;  %v311_v18 = vadd.f32 %v1686_v16, %v2146_v50  ;;  %v376_v59 = vadd.f32 %v2146_v50, %v375_v27  ;;  %v447_v2 = vmax.f32 %v381_v62, 0.0  ;;  %v2328_v62 = vld [vmem:[%s3058_s0 + $0x10] sm:$0xff] }
  0xd8   :  { %v305_v19 = vpop.f32.mrf.mxu0  ;;  %v1710_v34 = vpop.f32.mrf.mxu1 }
  0xd9   :  { %v306_v21 = vadd.f32 %v2146_v50, %v305_v19  ;;  %1745 = vmatprep.mubr.msk.f32.mxu1 %vm471_vm1, %v430_v17  ;;  %1809 = vmatprep.mubr.msk.f32.mxu0 %vm471_vm1, %v430_v17  ;;  %v433_v22 = vmax.f32 %v311_v18, 0.0  ;;  %v446_v63 = vmax.f32 %v376_v59, 0.0  ;;  %v391_v3 = vadd.f32 %v1710_v34, %v2146_v50  ;;  %v2284_v34 = vld [vmem:[%s3057_s5] ss:$0 sm:$0xff] }
  0xda   :  { %v1689_v23 = vpop.f32.mrf.mxu0  ;;  %1746 = vmatmul.mubr.msk.f32.gmra.mxu1 %vm471_vm1, %v431_v15  ;;  %1810 = vmatmul.mubr.msk.f32.gmra.mxu0 %vm471_vm1, %v431_v15  ;;  %v385_v42 = vpop.f32.mrf.mxu1 }
  0xdb   :  { %v432_v24 = vmax.f32 %v306_v21, 0.0  ;;  %v321_v25 = vadd.f32 %v1689_v23, %v2146_v50  ;;  %v386_v0 = vadd.f32 %v2146_v50, %v385_v42  ;;  %v449_v7 = vmax.f32 %v391_v3, 0.0 }
  0xdc   :  { %v315_v26 = vpop.f32.mrf.mxu0  ;;  %v1713_v49 = vpop.f32.mrf.mxu1 }
  0xdd   :  { %v316_v28 = vadd.f32 %v2146_v50, %v315_v26  ;;  %1748 = vmatprep.mubr.msk.f32.mxu1 %vm471_vm1, %v432_v24  ;;  %1812 = vmatprep.mubr.msk.f32.mxu0 %vm471_vm1, %v432_v24  ;;  %v435_v29 = vmax.f32 %v321_v25, 0.0  ;;  %v448_v4 = vmax.f32 %v386_v0, 0.0  ;;  %v401_v8 = vadd.f32 %v1713_v49, %v2146_v50 }
  0xde   :  { %v1692_v30 = vpop.f32.mrf.mxu0  ;;  %1749 = vmatmul.mubr.msk.f32.gmra.mxu1 %vm471_vm1, %v433_v22  ;;  %1813 = vmatmul.mubr.msk.f32.gmra.mxu0 %vm471_vm1, %v433_v22  ;;  %v395_v55 = vpop.f32.mrf.mxu1 }
  0xdf   :  { %v434_v31 = vmax.f32 %v316_v28, 0.0  ;;  %v331_v32 = vadd.f32 %v1692_v30, %v2146_v50  ;;  %v396_v5 = vadd.f32 %v2146_v50, %v395_v55  ;;  %v451_v12 = vmax.f32 %v401_v8, 0.0 }
  0xe0   :  { %v325_v33 = vpop.f32.mrf.mxu0  ;;  %v1716_v60 = vpop.f32.mrf.mxu1 }
  0xe1   :  { %v326_v35 = vadd.f32 %v2146_v50, %v325_v33  ;;  %1751 = vmatprep.mubr.msk.f32.mxu1 %vm471_vm1, %v434_v31  ;;  %1815 = vmatprep.mubr.msk.f32.mxu0 %vm471_vm1, %v434_v31  ;;  %v437_v36 = vmax.f32 %v331_v32, 0.0  ;;  %v450_v9 = vmax.f32 %v396_v5, 0.0  ;;  %v411_v13 = vadd.f32 %v1716_v60, %v2146_v50 }
  0xe2   :  { %v1695_v37 = vpop.f32.mrf.mxu0  ;;  %1752 = vmatmul.mubr.msk.f32.gmra.mxu1 %vm471_vm1, %v435_v29  ;;  %1816 = vmatmul.mubr.msk.f32.gmra.mxu0 %vm471_vm1, %v435_v29  ;;  %v405_v1 = vpop.f32.mrf.mxu1 }
  0xe3   :  { %v436_v38 = vmax.f32 %v326_v35, 0.0  ;;  %v341_v39 = vadd.f32 %v1695_v37, %v2146_v50  ;;  %v406_v10 = vadd.f32 %v2146_v50, %v405_v1  ;;  %v453_v16 = vmax.f32 %v411_v13, 0.0  ;;  %v2356_v13 = vld [vmem:[%s3058_s0 + $0x20] sm:$0xff] }
  0xe4   :  { %v335_v41 = vpop.f32.mrf.mxu0  ;;  %v1719_v6 = vpop.f32.mrf.mxu1 }
  0xe5   :  { %v336_v43 = vadd.f32 %v2146_v50, %v335_v41  ;;  %1754 = vmatprep.mubr.msk.f32.mxu1 %vm471_vm1, %v436_v38  ;;  %1818 = vmatprep.mubr.msk.f32.mxu0 %vm471_vm1, %v436_v38  ;;  %v439_v44 = vmax.f32 %v341_v39, 0.0  ;;  %v452_v14 = vmax.f32 %v406_v10, 0.0  ;;  %v421_v17 = vadd.f32 %v1719_v6, %v2146_v50 }
  0xe6   :  { %1755 = vmatmul.mubr.msk.f32.gmra.mxu1 %vm471_vm1, %v437_v36  ;;  %1819 = vmatmul.mubr.msk.f32.gmra.mxu0 %vm471_vm1, %v437_v36  ;;  %v415_v11 = vpop.f32.mrf.mxu1 }
  0xe7   :  { %v438_v46 = vmax.f32 %v336_v43, 0.0  ;;  %v416_v15 = vadd.f32 %v2146_v50, %v415_v11  ;;  %v455_v19 = vmax.f32 %v421_v17, 0.0  ;;  %v2268_v50 = vld [vmem:[%s3056_s7] ss:$0 sm:$0xff]  ;;  %v2494_v11 = vld [vmem:[%s3058_s0 + $0x78] sm:$0xff] }
  0xe9   :  { %1757 = vmatprep.mubr.msk.f32.mxu1 %vm471_vm1, %v438_v46  ;;  %1821 = vmatprep.mubr.msk.f32.mxu0 %vm471_vm1, %v438_v46  ;;  %v454_v18 = vmax.f32 %v416_v15, 0.0 }
  0xea   :  { %1758 = vmatmul.mubr.msk.f32.gmra.mxu1 %vm471_vm1, %v439_v44  ;;  %1822 = vmatmul.mubr.msk.f32.gmra.mxu0 %vm471_vm1, %v439_v44  ;;  %v30_v44 = vld [vmem:[%s3058_s0 + $0x8] sm:$0xff] }
  0xeb   :  { %1760 = vmatprep.mubr.msk.f32.mxu1 %vm471_vm1, %v440_v47  ;;  %1824 = vmatprep.mubr.msk.f32.mxu0 %vm471_vm1, %v440_v47 }
  0xee   :  { %1761 = vmatmul.mubr.msk.f32.gmra.mxu1 %vm471_vm1, %v441_v51  ;;  %1825 = vmatmul.mubr.msk.f32.gmra.mxu0 %vm471_vm1, %v441_v51  ;;  %v2307_v51 = vld [vmem:[%s3058_s0] sm:$0xff] }
  0xef   :  { %1763 = vmatprep.mubr.msk.f32.mxu1 %vm471_vm1, %v442_v53  ;;  %1827 = vmatprep.mubr.msk.f32.mxu0 %vm471_vm1, %v442_v53 }
  0xf2   :  { %1764 = vmatmul.mubr.msk.f32.gmra.mxu1 %vm471_vm1, %v443_v56  ;;  %1828 = vmatmul.mubr.msk.f32.gmra.mxu0 %vm471_vm1, %v443_v56 }
  0xf3   :  { %1766 = vmatprep.mubr.msk.f32.mxu1 %vm471_vm1, %v444_v58  ;;  %1830 = vmatprep.mubr.msk.f32.mxu0 %vm471_vm1, %v444_v58 }
  0xf6   :  { %1767 = vmatmul.mubr.msk.f32.gmra.mxu1 %vm471_vm1, %v445_v61  ;;  %1831 = vmatmul.mubr.msk.f32.gmra.mxu0 %vm471_vm1, %v445_v61 }
  0xf7   :  { %1769 = vmatprep.mubr.msk.f32.mxu1 %vm471_vm1, %v446_v63  ;;  %1833 = vmatprep.mubr.msk.f32.mxu0 %vm471_vm1, %v446_v63 }
  0xfa   :  { %1770 = vmatmul.mubr.msk.f32.gmra.mxu1 %vm471_vm1, %v447_v2  ;;  %1834 = vmatmul.mubr.msk.f32.gmra.mxu0 %vm471_vm1, %v447_v2  ;;  %v2338_v2 = vld [vmem:[%s3058_s0 + $0x28] sm:$0xff] }
  0xfb   :  { %1772 = vmatprep.mubr.msk.f32.mxu1 %vm471_vm1, %v448_v4  ;;  %1836 = vmatprep.mubr.msk.f32.mxu0 %vm471_vm1, %v448_v4 }
  0xfe   :  { %1773 = vmatmul.mubr.msk.f32.gmra.mxu1 %vm471_vm1, %v449_v7  ;;  %1837 = vmatmul.mubr.msk.f32.gmra.mxu0 %vm471_vm1, %v449_v7 }
  0xff   :  { %1775 = vmatprep.mubr.msk.f32.mxu1 %vm471_vm1, %v450_v9  ;;  %1839 = vmatprep.mubr.msk.f32.mxu0 %vm471_vm1, %v450_v9 }
 0x102   :  { %1776 = vmatmul.mubr.msk.f32.gmra.mxu1 %vm471_vm1, %v451_v12  ;;  %1840 = vmatmul.mubr.msk.f32.gmra.mxu0 %vm471_vm1, %v451_v12 }
 0x103   :  { %1778 = vmatprep.mubr.msk.f32.mxu1 %vm471_vm1, %v452_v14  ;;  %1842 = vmatprep.mubr.msk.f32.mxu0 %vm471_vm1, %v452_v14 }
 0x106   :  { %1779 = vmatmul.mubr.msk.f32.gmra.mxu1 %vm471_vm1, %v453_v16  ;;  %1843 = vmatmul.mubr.msk.f32.gmra.mxu0 %vm471_vm1, %v453_v16 }
 0x107   :  { %1781 = vmatprep.mubr.msk.f32.mxu1 %vm471_vm1, %v454_v18  ;;  %1845 = vmatprep.mubr.msk.f32.mxu0 %vm471_vm1, %v454_v18  ;;  %v2462_v18 = vld [vmem:[%s3058_s0 + $0x68] sm:$0xff] }
 0x108   :  { %3079 = vst [vmem:[#allocation7_spill] sm:$0xff] %v2462_v18 }
 0x10a   :  { %1782 = vmatmul.mubr.msk.f32.gmra.mxu1 %vm471_vm1, %v455_v19  ;;  %1846 = vmatmul.mubr.msk.f32.gmra.mxu0 %vm471_vm1, %v455_v19 }
 0x18e   :  { %v1738_v20 = vpop.f32.mrf.mxu1  ;;  %v1802_v21 = vpop.f32.mrf.mxu0 }
 0x18f   :  { %v2271_v22 = vadd.f32 %v1802_v21, %v2268_v50  ;;  %v640_v43 = vadd.f32 %v1738_v20, %v2284_v34 }
 0x190   :  { %v634_v23 = vpop.f32.mrf.mxu1  ;;  %v874_v24 = vpop.f32.mrf.mxu0 }
 0x191   :  { %v1066_v25 = vsub.f32 0.0, %v2271_v22  ;;  %v2278_v30 = vadd.f32 %v2268_v50, %v874_v24  ;;  %v2298_v45 = vadd.f32 %v2284_v34, %v634_v23  ;;  %v1034_v60 = vsub.f32 %v30_v44, %v640_v43 }
 0x192   :  { %v1741_v26 = vpop.f32.mrf.mxu1  ;;  %v1805_v27 = vpop.f32.mrf.mxu0  ;;  %v1194_v61 = vsub.f32 -0.9189385, %v2271_v22  ;;  %v2479_v22 = vld [vmem:[%s3058_s0 + $0x60] sm:$0xff] }
 0x193   :  { %v1099_v28 = vmul.f32 1.442695, %v1066_v25  ;;  %v2275_v29 = vadd.f32 %v1805_v27, %v2268_v50  ;;  %v1065_v39 = vsub.f32 0.0, %v2278_v30  ;;  %v2310_v52 = vadd.f32 %v1741_v26, %v2284_v34  ;;  %v2372_v25 = vld [vmem:[%s3058_s0 + $0x38] sm:$0xff] }
 0x194   :  { %v644_v31 = vpop.f32.mrf.mxu1  ;;  %v884_v32 = vpop.f32.mrf.mxu0 }
 0x195   :  { %1852 = vpow2.f32 %v1099_v28  ;;  %v1068_v33 = vsub.f32 0.0, %v2275_v29  ;;  %v2287_v35 = vadd.f32 %v2268_v50, %v884_v32  ;;  %v1097_v53 = vmul.f32 1.442695, %v1065_v39  ;;  %v2387_v39 = vld [vmem:[%s3058_s0 + $0x30] sm:$0xff] }
 0x196   :  { %v1744_v36 = vpop.f32.mrf.mxu1  ;;  %v1808_v37 = vpop.f32.mrf.mxu0  ;;  %v2318_v55 = vadd.f32 %v2284_v34, %v644_v31  ;;  %v1036_v8 = vsub.f32 %v2315_v54, %v2310_v52  ;;  %v2402_v54 = vld [vmem:[%s3058_s0 + $0x48] sm:$0xff] }
 0x197   :  { %v1103_v38 = vmul.f32 1.442695, %v1068_v33  ;;  %v2291_v40 = vadd.f32 %v1808_v37, %v2268_v50  ;;  %v1067_v46 = vsub.f32 0.0, %v2287_v35  ;;  %v2331_v63 = vadd.f32 %v1744_v36, %v2284_v34  ;;  %v2447_v37 = vld [vmem:[%s3058_s0 + $0x50] sm:$0xff] }
 0x198   :  { %v654_v41 = vpop.f32.mrf.mxu1  ;;  %v894_v42 = vpop.f32.mrf.mxu0 }
 0x199   :  { %1854 = vpow2.f32 %v1103_v38  ;;  %v2302_v47 = vadd.f32 %v2268_v50, %v894_v42  ;;  %v1070_v56 = vsub.f32 0.0, %v2291_v40  ;;  %v1101_v1 = vmul.f32 1.442695, %v1067_v46 }
 0x19a   :  { %v1747_v48 = vpop.f32.mrf.mxu1  ;;  %v1811_v49 = vpop.f32.mrf.mxu0  ;;  %v2349_v10 = vadd.f32 %v2284_v34, %v654_v41  ;;  %1856 = vpow2.f32 %v1097_v53 }
 0x19b   :  { %v2322_v57 = vadd.f32 %v1811_v49, %v2268_v50  ;;  %v1069_v3 = vsub.f32 0.0, %v2302_v47  ;;  %v1107_v12 = vmul.f32 1.442695, %v1070_v56  ;;  %v2363_v19 = vadd.f32 %v1747_v48, %v2284_v34 }
 0x19c   :  { %v664_v58 = vpop.f32.mrf.mxu1  ;;  %v904_v59 = vpop.f32.mrf.mxu0  ;;  %1858 = vpow2.f32 %v1101_v1 }
 0x19d   :  { %v2342_v4 = vadd.f32 %v2268_v50, %v904_v59  ;;  %v1072_v14 = vsub.f32 0.0, %v2322_v57  ;;  %v1105_v24 = vmul.f32 1.442695, %v1069_v3  ;;  %v2378_v32 = vadd.f32 %v2284_v34, %v664_v58 }
 0x19e   :  { %v1750_v5 = vpop.f32.mrf.mxu1  ;;  %v1814_v6 = vpop.f32.mrf.mxu0  ;;  %1860 = vpow2.f32 %v1107_v12 }
 0x19f   :  { %v2366_v20 = vadd.f32 %v1814_v6, %v2268_v50  ;;  %v1071_v26 = vsub.f32 0.0, %v2342_v4  ;;  %v1111_v38 = vmul.f32 1.442695, %v1072_v14  ;;  %v2396_v48 = vadd.f32 %v1750_v5, %v2284_v34  ;;  %v2417_v14 = vld [vmem:[%s3058_s0 + $0x40] sm:$0xff] }
 0x1a0   :  { %v674_v15 = vpop.f32.mrf.mxu1  ;;  %v914_v16 = vpop.f32.mrf.mxu0  ;;  %1862 = vpow2.f32 %v1105_v24 }
 0x1a1   :  { %v2381_v33 = vadd.f32 %v2268_v50, %v914_v16  ;;  %v1074_v49 = vsub.f32 0.0, %v2366_v20  ;;  %v1109_v53 = vmul.f32 1.442695, %v1071_v26  ;;  %v2410_v3 = vadd.f32 %v2284_v34, %v674_v15 }
 0x1a2   :  { %v1853_v21 = vpop.eup %1852  ;;  %v1753_v27 = vpop.f32.mrf.mxu1  ;;  %1864 = vpow2.f32 %v1111_v38 }
 0x1a3   :  { %v1817_v28 = vpop.f32.mrf.mxu0  ;;  %v1162_v36 = vmul.f32 %v1853_v21, %v1034_v60  ;;  %v1073_v5 = vsub.f32 0.0, %v2381_v33  ;;  %v2427_v38 = vadd.f32 %v1753_v27, %v2284_v34  ;;  %1866 = vpow2.f32 %v1109_v53 }
 0x1a4   :  { %v2390_v41 = vadd.f32 %v1817_v28, %v2268_v50  ;;  %v684_v42 = vpop.f32.mrf.mxu1  ;;  %v1115_v28 = vmul.f32 1.442695, %v1074_v49 }
 0x1a5   :  { %v924_v43 = vpop.f32.mrf.mxu0  ;;  %v1226_v60 = vmul.f32 0.5, %v1162_v36  ;;  %v2441_v27 = vadd.f32 %v2284_v34, %v684_v42 }
 0x1a6   :  { %3074 = vst [vmem:[#allocation2_spill] sm:$0xff] %v2390_v41  ;;  %v1855_v52 = vpop.eup %1854  ;;  %v2405_v56 = vadd.f32 %v2268_v50, %v924_v43  ;;  %v1756_v58 = vpop.f32.mrf.mxu1  ;;  %v1076_v16 = vsub.f32 0.0, %v2390_v41  ;;  %v2432_v43 = vld [vmem:[%s3058_s0 + $0x58] sm:$0xff]  ;;  %1868 = vpow2.f32 %v1115_v28  ;;  %v2514_v41 = vld [vmem:[%s3058_s0 + $0x70] sm:$0xff] }
 0x1a7   :  { %v1820_v59 = vpop.f32.mrf.mxu0  ;;  %v1164_v6 = vmul.f32 %v1855_v52, %v1036_v8  ;;  %v1258_v15 = vmul.f32 %v1226_v60, %v1162_v36  ;;  %v1113_v8 = vmul.f32 1.442695, %v1073_v5  ;;  %v1857_v5 = vpop.eup %1856 }
 0x1a8   :  { %3075 = vst [vmem:[#allocation3_spill] sm:$0xff] %v2405_v56  ;;  %v2421_v21 = vadd.f32 %v1820_v59, %v2268_v50  ;;  %v694_v24 = vpop.f32.mrf.mxu1  ;;  %v1075_v52 = vsub.f32 0.0, %v2405_v56  ;;  %v1119_v23 = vmul.f32 1.442695, %v1076_v16  ;;  %v2457_v16 = vadd.f32 %v1756_v58, %v2284_v34 }
 0x1a9   :  { %v934_v26 = vpop.f32.mrf.mxu0  ;;  %v1228_v53 = vmul.f32 0.5, %v1164_v6  ;;  %v1290_v28 = vsub.f32 %v1194_v61, %v1258_v15  ;;  %v1859_v44 = vpop.eup %1858  ;;  %1870 = vpow2.f32 %v1113_v8 }
 0x1aa   :  { %3076 = vst [vmem:[#allocation4_spill] sm:$0xff] %v2421_v21  ;;  %v2436_v59 = vadd.f32 %v2268_v50, %v934_v26  ;;  %v1759_v46 = vpop.f32.mrf.mxu1  ;;  %v1078_v26 = vsub.f32 0.0, %v2421_v21  ;;  %3078 = vst [vmem:[#allocation6_spill] sm:$0xff] %v2457_v16  ;;  %v1117_v1 = vmul.f32 1.442695, %v1075_v52  ;;  %v2473_v52 = vadd.f32 %v2284_v34, %v694_v24 }
 0x1ab   :  { %v1823_v12 = vpop.f32.mrf.mxu0  ;;  %v1260_v7 = vmul.f32 %v1228_v53, %v1164_v6  ;;  %1872 = vpow2.f32 %v1119_v23  ;;  %v2488_v23 = vadd.f32 %v1759_v46, %v2284_v34  ;;  %v1325_v53 = vsel %vm1321_vm2, %v1290_v28, 0.0 }
 0x1ac   :  { %v2451_v36 = vadd.f32 %v1823_v12, %v2268_v50  ;;  %v704_v60 = vpop.f32.mrf.mxu1  ;;  %v1077_v12 = vsub.f32 0.0, %v2436_v59  ;;  %v1123_v0 = vmul.f32 1.442695, %v1078_v26  ;;  %1874 = vpow2.f32 %v1117_v1  ;;  %1326 = vadd.xlane.f32.xlu0 %v1325_v53 }
 0x1ad   :  { %v944_v49 = vpop.f32.mrf.mxu0  ;;  %3081 = vst [vmem:[#allocation9_spill] sm:$0xff] %v2488_v23  ;;  %v2503_v1 = vadd.f32 %v2284_v34, %v704_v60  ;;  %v3084_v16 = vsub.f32 %v2307_v51, %v2298_v45 }
 0x1ae   :  { %3077 = vst [vmem:[#allocation5_spill] sm:$0xff] %v2451_v36  ;;  %v2466_v17 = vadd.f32 %v2268_v50, %v944_v49  ;;  %v1762_v42 = vpop.f32.mrf.mxu1  ;;  %v1080_v61 = vsub.f32 0.0, %v2451_v36  ;;  %v2482_v49 = vpop.eup %1860  ;;  %v1121_v26 = vmul.f32 1.442695, %v1077_v12  ;;  %v3083_v12 = vsub.f32 -0.9189385, %v2275_v29 }
 0x1af   :  { %v1826_v31 = vpop.f32.mrf.mxu0  ;;  %v1863_v21 = vpop.eup %1862  ;;  %v1161_v18 = vmul.f32 %v1857_v5, %v3084_v16  ;;  %1876 = vpow2.f32 %v1123_v0  ;;  %v2524_v45 = vadd.f32 %v1762_v42, %v2284_v34  ;;  %v2531_v16 = vld [vmem:[%s3058_s0 + $0x88] sm:$0xff] }
 0x1b0   :  { %3080 = vst [vmem:[#allocation8_spill] sm:$0xff] %v2466_v17  ;;  %v714_v15 = vpop.f32.mrf.mxu1  ;;  %v1079_v58 = vsub.f32 0.0, %v2466_v17  ;;  %v2498_v9 = vadd.f32 %v1826_v31, %v2268_v50  ;;  %v1292_v28 = vsub.f32 %v3083_v12, %v1260_v7  ;;  %v1127_v53 = vmul.f32 1.442695, %v1080_v61  ;;  %v2519_v56 = vpop.eup %1864 }
 0x1b1   :  { %v954_v8 = vpop.f32.mrf.mxu0  ;;  %3086 = vst [vmem:[#allocation12_spill] sm:$0xff] %v2524_v45  ;;  %v1225_v0 = vmul.f32 0.5, %v1161_v18  ;;  %1878 = vpow2.f32 %v1121_v26  ;;  %v1867_v29 = vpop.eup %1866  ;;  %v2541_v31 = vadd.f32 %v2284_v34, %v714_v15 }
 0x1b2   :  { %3082 = vst [vmem:[#allocation10_spill] sm:$0xff] %v2498_v9  ;;  %v1765_v24 = vpop.f32.mrf.mxu1  ;;  %v2517_v46 = vadd.f32 %v2268_v50, %v954_v8  ;;  %v1331_v51 = vsel %vm1321_vm2, %v1292_v28, 0.0  ;;  %v1125_v5 = vmul.f32 1.442695, %v1079_v58  ;;  %v1082_v61 = vsub.f32 0.0, %v2498_v9 }
 0x1b3   :  { %v1829_v6 = vpop.f32.mrf.mxu0  ;;  %1332 = vadd.xlane.f32.xlu1 %v1331_v51  ;;  %v1257_v26 = vmul.f32 %v1225_v0, %v1161_v18  ;;  %v3087_v58 = vsub.f32 %v2328_v62, %v2318_v55  ;;  %1880 = vpow2.f32 %v1127_v53  ;;  %v2552_v18 = vld [vmem:[%s3058_s0 + $0x80] sm:$0xff]  ;;  %v3088_v55 = vsub.f32 -0.9189385, %v2278_v30  ;;  %v2559_v53 = vpop.eup %1868  ;;  %v2569_v30 = vld [vmem:[%s3058_s0 + $0x98] sm:$0xff] }
 0x1b4   :  { %3085 = vst [vmem:[#allocation11_spill] sm:$0xff] %v2517_v46  ;;  %v724_v8 = vpop.f32.mrf.mxu1  ;;  %v1081_v36 = vsub.f32 0.0, %v2517_v46  ;;  %v2545_v51 = vadd.f32 %v1829_v6, %v2268_v50  ;;  %1882 = vpow2.f32 %v1125_v5  ;;  %v1131_v6 = vmul.f32 1.442695, %v1082_v61  ;;  %3090 = vst [vmem:[#allocation14_spill] sm:$0xff] %v2569_v30 }
 0x1b5   :  { %v964_v60 = vpop.f32.mrf.mxu0  ;;  %v1163_v7 = vmul.f32 %v1859_v44, %v3087_v58  ;;  %v1289_v62 = vsub.f32 %v3088_v55, %v1257_v26  ;;  %v2563_v58 = vadd.f32 %v1765_v24, %v2284_v34  ;;  %v3091_v5 = vsub.f32 %v2356_v13, %v2349_v10 }
 0x1b6   :  { %v2557_v44 = vadd.f32 %v2268_v50, %v964_v60  ;;  %v1768_v28 = vpop.f32.mrf.mxu1  ;;  %v2577_v55 = vpop.eup %1870  ;;  %v1129_v0 = vmul.f32 1.442695, %v1081_v36  ;;  %v1084_v9 = vsub.f32 0.0, %v2545_v51  ;;  %1884 = vpow2.f32 %v1131_v6 }
 0x1b7   :  { %v1832_v12 = vpop.f32.mrf.mxu0  ;;  %v1227_v15 = vmul.f32 0.5, %v1163_v7  ;;  %3089 = vst [vmem:[#allocation13_spill] sm:$0xff] %v2563_v58  ;;  %v1322_v17 = vsel %vm1321_vm2, %v1289_v62, 0.0  ;;  %v1165_v61 = vmul.f32 %v1863_v21, %v3091_v5  ;;  %v3093_v21 = vsub.f32 %v2338_v2, %v2331_v63  ;;  %v2605_v63 = vld [vmem:[%s3058_s0 + $0x90] sm:$0xff] }
 0x1b8   :  { %v2572_v26 = vadd.f32 %v1832_v12, %v2268_v50  ;;  %1323 = vadd.xlane.f32.xlu0 %v1322_v17  ;;  %v1083_v12 = vsub.f32 0.0, %v2557_v44  ;;  %v2595_v36 = vadd.f32 %v2284_v34, %v724_v8  ;;  %v2598_v62 = vadd.f32 %v1768_v28, %v2284_v34  ;;  %v734_v24 = vpop.f32.mrf.mxu1 }
 0x1b9   :  { %v974_v23 = vpop.f32.mrf.mxu0  ;;  %v1259_v60 = vmul.f32 %v1227_v15, %v1163_v7  ;;  %v2583_v7 = vpop.eup %1872  ;;  %v3092_v15 = vsub.f32 -0.9189385, %v2287_v35  ;;  %v1229_v13 = vmul.f32 0.5, %v1165_v61  ;;  %v1166_v5 = vmul.f32 %v2482_v49, %v3093_v21 }
 0x1ba   :  { %v2600_v35 = vpop.eup %1874  ;;  %v1086_v49 = vsub.f32 0.0, %v2572_v26  ;;  %1886 = vpow2.f32 %v1129_v0  ;;  %v1135_v8 = vmul.f32 1.442695, %v1084_v9  ;;  %v1133_v30 = vmul.f32 1.442695, %v1083_v12 }
 0x1bb   :  { %v1835_v42 = vpop.f32.mrf.mxu0  ;;  %v1291_v10 = vsub.f32 %v3092_v15, %v1259_v60  ;;  %v1261_v6 = vmul.f32 %v1229_v13, %v1165_v61  ;;  %v1230_v60 = vmul.f32 0.5, %v1166_v5  ;;  %v3094_v15 = vsub.f32 %v2387_v39, %v2378_v32 }
 0x1bc   :  { %v2613_v58 = vpop.eup %1876  ;;  %v3095_v61 = vsub.f32 -0.9189385, %v2302_v47  ;;  %v2623_v9 = vadd.f32 %v2268_v50, %v974_v23  ;;  %v2629_v12 = vadd.f32 %v1835_v42, %v2268_v50  ;;  %v1139_v28 = vmul.f32 1.442695, %v1086_v49 }
 0x1bd   :  { %v984_v45 = vpop.f32.mrf.mxu0  ;;  %v1328_v2 = vsel %vm1321_vm2, %v1291_v10, 0.0  ;;  %v1167_v21 = vmul.f32 %v1867_v29, %v3094_v15  ;;  %v2618_v10 = vld [vmem:[%s3058_s0 + $0xa8] sm:$0xff]  ;;  %v1262_v13 = vmul.f32 %v1230_v60, %v1166_v5  ;;  %v1771_v29 = vpop.f32.mrf.mxu1  ;;  %1888 = vpow2.f32 %v1135_v8 }
 0x1be   :  { %1329 = vadd.xlane.f32.xlu1 %v1328_v2  ;;  %v1293_v0 = vsub.f32 %v3095_v61, %v1261_v6  ;;  %3096 = vst [vmem:[#allocation15_spill] sm:$0xff] %v2629_v12  ;;  %v2631_v15 = vpop.eup %1878  ;;  %v3097_v6 = vsub.f32 -0.9189385, %v2291_v40  ;;  %v2637_v5 = vadd.f32 %v2268_v50, %v984_v45  ;;  %v3098_v42 = vsub.f32 %v2372_v25, %v2363_v19 }
 0x1bf   :  { %v1838_v46 = vpop.f32.mrf.mxu0  ;;  %v1231_v2 = vmul.f32 0.5, %v1167_v21  ;;  %1890 = vpow2.f32 %v1133_v30  ;;  %v2648_v40 = vadd.f32 %v2284_v34, %v734_v24  ;;  %v1085_v45 = vsub.f32 0.0, %v2623_v9 }
 0x1c0   :  { %v1334_v47 = vsel %vm1321_vm2, %v1293_v0, 0.0  ;;  %v1294_v23 = vsub.f32 %v3097_v6, %v1262_v13  ;;  %v1168_v39 = vmul.f32 %v2519_v56, %v3098_v42  ;;  %v2645_v32 = vpop.eup %1880  ;;  %v1088_v19 = vsub.f32 0.0, %v2629_v12  ;;  %v744_v0 = vpop.f32.mrf.mxu1 }
 0x1c1   :  { %v994_v17 = vpop.f32.mrf.mxu0  ;;  %1335 = vadd.xlane.f32.xlu0 %v1334_v47  ;;  %v1263_v61 = vmul.f32 %v1231_v2, %v1167_v21  ;;  %v2655_v21 = vld [vmem:[%s3058_s0 + $0xa0] sm:$0xff]  ;;  %v3099_v25 = vsub.f32 -0.9189385, %v2342_v4  ;;  %v3100_v24 = vsub.f32 %v2417_v14, %v2410_v3  ;;  %v2664_v2 = vpop.eup %1882  ;;  %1892 = vpow2.f32 %v1139_v28  ;;  %v2674_v4 = vld [vmem:[%s3058_s0 + $0xb8] sm:$0xff] }
 0x1c2   :  { %v1337_v8 = vsel %vm1321_vm2, %v1294_v23, 0.0  ;;  %v1232_v30 = vmul.f32 0.5, %v1168_v39  ;;  %v2668_v6 = vadd.f32 %v1771_v29, %v2284_v34  ;;  %v1087_v23 = vsub.f32 0.0, %v2637_v5 }
 0x1c3   :  { %v1841_v49 = vpop.f32.mrf.mxu0  ;;  %1338 = vadd.xlane.f32.xlu1 %v1337_v8  ;;  %v1295_v56 = vsub.f32 %v3099_v25, %v1263_v61  ;;  %v1169_v13 = vmul.f32 %v2577_v55, %v3100_v24  ;;  %v2678_v14 = vadd.f32 %v1838_v46, %v2268_v50  ;;  %v1137_v29 = vmul.f32 1.442695, %v1085_v45  ;;  %v1774_v46 = vpop.f32.mrf.mxu1 }
 0x1c4   :  { %v1264_v3 = vmul.f32 %v1232_v30, %v1168_v39  ;;  %v3101_v25 = vsub.f32 %v2402_v54, %v2396_v48  ;;  %v1143_v47 = vmul.f32 1.442695, %v1088_v19  ;;  %v3102_v39 = vsub.f32 -0.9189385, %v2322_v57  ;;  %v2692_v12 = vpop.eup %1884 }
 0x1c5   :  { %v1340_v61 = vsel %vm1321_vm2, %v1295_v56, 0.0  ;;  %v1233_v55 = vmul.f32 0.5, %v1169_v13  ;;  %v1004_v28 = vpop.f32.mrf.mxu0  ;;  %v2690_v60 = vadd.f32 %v2268_v50, %v994_v17  ;;  %v2700_v54 = vadd.f32 %v1841_v49, %v2268_v50 }
 0x1c6   :  { %1341 = vadd.xlane.f32.xlu0 %v1340_v61  ;;  %v1170_v24 = vmul.f32 %v2559_v53, %v3101_v25  ;;  %v1296_v56 = vsub.f32 %v3102_v39, %v1264_v3  ;;  %v2697_v61 = vadd.f32 %v2284_v34, %v744_v0  ;;  %v1141_v53 = vmul.f32 1.442695, %v1087_v23  ;;  %v2711_v0 = vld [vmem:[%s3058_s0 + $0xb0] sm:$0xff] }
 0x1c7   :  { %v1265_v30 = vmul.f32 %v1233_v55, %v1169_v13  ;;  %v1090_v19 = vsub.f32 0.0, %v2678_v14  ;;  %v3103_v17 = vsub.f32 -0.9189385, %v2381_v33  ;;  %v1844_v3 = vpop.f32.mrf.mxu0  ;;  %v2706_v55 = vpop.eup %1886  ;;  %1894 = vpow2.f32 %v1137_v29 }
 0x1c8   :  { %v1234_v48 = vmul.f32 0.5, %v1170_v24  ;;  %v1343_v57 = vsel %vm1321_vm2, %v1296_v56, 0.0  ;;  %v2714_v49 = vadd.f32 %v1774_v46, %v2284_v34  ;;  %v3104_v25 = vsub.f32 %v2447_v37, %v2441_v27  ;;  %v754_v56 = vpop.f32.mrf.mxu1  ;;  %v2728_v46 = vld [vmem:[%s3058_s0 + $0xc8] sm:$0xff] }
 0x1c9   :  { %v1297_v13 = vsub.f32 %v3103_v17, %v1265_v30  ;;  %1344 = vadd.xlane.f32.xlu1 %v1343_v57  ;;  %1896 = vpow2.f32 %v1143_v47  ;;  %v1089_v29 = vsub.f32 0.0, %v2690_v60  ;;  %v2723_v30 = vadd.f32 %v2268_v50, %v1004_v28 }
 0x1ca   :  { %v1266_v23 = vmul.f32 %v1234_v48, %v1170_v24  ;;  %v1171_v33 = vmul.f32 %v2600_v35, %v3104_v25  ;;  %v3105_v24 = vsub.f32 -0.9189385, %v2366_v20  ;;  %v1092_v27 = vsub.f32 0.0, %v2700_v54  ;;  %v2740_v25 = vpop.eup %1888 }
 0x1cb   :  { %v1346_v39 = vsel %vm1321_vm2, %v1297_v13, 0.0  ;;  %v3106_v47 = vsub.f32 %v2432_v43, %v2427_v38  ;;  %1898 = vpow2.f32 %v1141_v53  ;;  %v1147_v17 = vmul.f32 1.442695, %v1090_v19  ;;  %v1014_v13 = vpop.f32.mrf.mxu0 }
 0x1cc   :  { %1347 = vadd.xlane.f32.xlu0 %v1346_v39  ;;  %v1298_v37 = vsub.f32 %v3105_v24, %v1266_v23  ;;  %v1235_v35 = vmul.f32 0.5, %v1171_v33  ;;  %v1091_v39 = vsub.f32 0.0, %v2723_v30  ;;  %v2744_v8 = vpop.eup %1890  ;;  %v1145_v43 = vmul.f32 1.442695, %v1089_v29 }
 0x1cd   :  { %v1172_v48 = vmul.f32 %v2583_v7, %v3106_v47  ;;  %v1777_v7 = vpop.f32.mrf.mxu1  ;;  %v2749_v53 = vadd.f32 %v1844_v3, %v2268_v50  ;;  %v3107_v19 = vsub.f32 %v2479_v22, %v2473_v52  ;;  %v2758_v28 = vadd.f32 %v2268_v50, %v1014_v13  ;;  %v1847_v52 = vpop.f32.mrf.mxu0  ;;  %v2773_v13 = vld [vmem:[%s3058_s0 + $0xc0] sm:$0xff] }
 0x1ce   :  { %v1349_v20 = vsel %vm1321_vm2, %v1298_v37, 0.0  ;;  %v1267_v23 = vmul.f32 %v1235_v35, %v1171_v33  ;;  %v1151_v33 = vmul.f32 1.442695, %v1092_v27  ;;  %v3108_v35 = vld [vmem:[#allocation3_spill] sm:$0xff]  ;;  %v2760_v38 = vpop.eup %1892  ;;  %1900 = vpow2.f32 %v1147_v17  ;;  %v3110_v27 = vld [vmem:[#allocation2_spill] sm:$0xff] }
 0x1cf   :  { %v1236_v24 = vmul.f32 0.5, %v1172_v48  ;;  %1350 = vadd.xlane.f32.xlu1 %v1349_v20  ;;  %v1173_v37 = vmul.f32 %v2631_v15, %v3107_v19  ;;  %v3109_v47 = vsub.f32 -0.9189385, %v3108_v35  ;;  %v2763_v29 = vadd.f32 %v2284_v34, %v754_v56  ;;  %v764_v17 = vpop.f32.mrf.mxu1  ;;  %v3112_v35 = vld [vmem:[#allocation7_spill] sm:$0xff] }
 0x1d0   :  { %v1094_v3 = vsub.f32 0.0, %v2749_v53  ;;  %v1149_v15 = vmul.f32 1.442695, %v1091_v39  ;;  %v3111_v19 = vsub.f32 -0.9189385, %v3110_v27  ;;  %1902 = vpow2.f32 %v1145_v43 }
 0x1d1   :  { %v1299_v57 = vsub.f32 %v3109_v47, %v1267_v23  ;;  %v1268_v45 = vmul.f32 %v1236_v24, %v1172_v48  ;;  %v1237_v20 = vmul.f32 0.5, %v1173_v37  ;;  %v1093_v48 = vsub.f32 0.0, %v2758_v28 }
 0x1d2   :  { %v2776_v56 = vadd.f32 %v1777_v7, %v2284_v34  ;;  %1904 = vpow2.f32 %v1151_v33  ;;  %v1155_v43 = vmul.f32 1.442695, %v1094_v3  ;;  %v3115_v7 = vsub.f32 -0.9189385, %v2436_v59  ;;  %v2801_v59 = vld [vmem:[%s3058_s0 + $0xd0] sm:$0xff] }
 0x1d3   :  { %v1352_v22 = vsel %vm1321_vm2, %v1299_v57, 0.0  ;;  %v1300_v23 = vsub.f32 %v3111_v19, %v1268_v45  ;;  %v1269_v24 = vmul.f32 %v1237_v20, %v1173_v37  ;;  %v3113_v57 = vld [vmem:[#allocation6_spill] sm:$0xff]  ;;  %v1153_v27 = vmul.f32 1.442695, %v1093_v48 }
 0x1d4   :  { %1353 = vadd.xlane.f32.xlu0 %v1352_v22  ;;  %v3114_v39 = vsub.f32 %v3112_v35, %v3113_v57  ;;  %v2784_v19 = vadd.f32 %v1847_v52, %v2268_v50  ;;  %v3116_v37 = vsub.f32 %v2514_v41, %v2503_v1  ;;  %v1024_v35 = vpop.f32.mrf.mxu0  ;;  %v2795_v33 = vadd.f32 %v2284_v34, %v764_v17  ;;  %v1895_v3 = vpop.eup %1894 }
 0x1d5   :  { %v1355_v45 = vsel %vm1321_vm2, %v1300_v23, 0.0  ;;  %v1301_v42 = vsub.f32 %v3115_v7, %v1269_v24  ;;  %1906 = vpow2.f32 %v1149_v15  ;;  %v2803_v23 = vpop.f32.mrf.mxu1  ;;  %v2807_v15 = vadd.f32 %v2268_v50, %v1024_v35  ;;  %v3117_v24 = vld [vmem:[#allocation9_spill] sm:$0xff] }
 0x1d6   :  { %v1174_v47 = vmul.f32 %v2613_v58, %v3114_v39  ;;  %1356 = vadd.xlane.f32.xlu1 %v1355_v45  ;;  %v1175_v20 = vmul.f32 %v2664_v2, %v3116_v37  ;;  %v1057_v58 = vsub.f32 %v2773_v13, %v2763_v29  ;;  %v1096_v52 = vsub.f32 0.0, %v2784_v19  ;;  %v1897_v48 = vpop.eup %1896  ;;  %v3122_v37 = vld [vmem:[#allocation12_spill] sm:$0xff] }
 0x1d7   :  { %v1358_v41 = vsel %vm1321_vm2, %v1301_v42, 0.0  ;;  %1908 = vpow2.f32 %v1153_v27  ;;  %v3118_v57 = vsub.f32 %v2494_v11, %v3117_v24  ;;  %v3119_v45 = vsub.f32 %v2552_v18, %v2541_v31  ;;  %v3120_v42 = vld [vmem:[#allocation4_spill] sm:$0xff]  ;;  %v774_v18 = vpop.f32.mrf.mxu1 }
 0x1d8   :  { %v1238_v22 = vmul.f32 0.5, %v1174_v47  ;;  %v1239_v2 = vmul.f32 0.5, %v1175_v20  ;;  %1359 = vadd.xlane.f32.xlu0 %v1358_v41  ;;  %v1159_v17 = vmul.f32 1.442695, %v1096_v52  ;;  %1910 = vpow2.f32 %v1155_v43  ;;  %v1899_v35 = vpop.eup %1898  ;;  %v3124_v43 = vld [vmem:[#allocation8_spill] sm:$0xff] }
 0x1d9   :  { %v1176_v39 = vmul.f32 %v2645_v32, %v3118_v57  ;;  %v1177_v7 = vmul.f32 %v2706_v55, %v3119_v45  ;;  %v3123_v52 = vsub.f32 %v2531_v16, %v3122_v37  ;;  %v1059_v11 = vsub.f32 %v2801_v59, %v2795_v33  ;;  %v3128_v45 = vld [vmem:[#allocation13_spill] sm:$0xff] }
 0x1da   :  { %v1270_v1 = vmul.f32 %v1238_v22, %v1174_v47  ;;  %v3121_v47 = vsub.f32 -0.9189385, %v3120_v42  ;;  %v1271_v22 = vmul.f32 %v1239_v2, %v1175_v20  ;;  %1912 = vpow2.f32 %v1159_v17  ;;  %v3127_v17 = vld [vmem:[#allocation14_spill] sm:$0xff] }
 0x1db   :  { %v1178_v50 = vmul.f32 %v2692_v12, %v3123_v52  ;;  %v1095_v32 = vsub.f32 0.0, %v2807_v15  ;;  %v1240_v31 = vmul.f32 0.5, %v1176_v39  ;;  %v3125_v41 = vsub.f32 -0.9189385, %v3124_v43  ;;  %v1783_v43 = vpop.f32.mrf.mxu1 }
 0x1dc   :  { %v1302_v27 = vsub.f32 %v3121_v47, %v1270_v1  ;;  %v1241_v20 = vmul.f32 0.5, %v1177_v7  ;;  %v3126_v12 = vsub.f32 %v2605_v63, %v2595_v36  ;;  %v3129_v42 = vsub.f32 %v3127_v17, %v3128_v45  ;;  %v3135_v17 = vld [vmem:[#allocation10_spill] sm:$0xff] }
 0x1dd   :  { %v1303_v1 = vsub.f32 %v3125_v41, %v1271_v22  ;;  %v1242_v2 = vmul.f32 0.5, %v1178_v50  ;;  %v1157_v16 = vmul.f32 1.442695, %v1095_v32  ;;  %v1272_v24 = vmul.f32 %v1240_v31, %v1176_v39  ;;  %v1901_v32 = vpop.eup %1900  ;;  %v3131_v39 = vld [vmem:[#allocation5_spill] sm:$0xff]  ;;  %v3133_v41 = vld [vmem:[#allocation11_spill] sm:$0xff] }
 0x1de   :  { %v1361_v55 = vsel %vm1321_vm2, %v1302_v27, 0.0  ;;  %v1179_v57 = vmul.f32 %v2744_v8, %v3126_v12  ;;  %v1180_v47 = vmul.f32 %v2740_v25, %v3129_v42  ;;  %v1273_v37 = vmul.f32 %v1241_v20, %v1177_v7 }
 0x1df   :  { %1362 = vadd.xlane.f32.xlu1 %v1361_v55  ;;  %v1364_v27 = vsel %vm1321_vm2, %v1303_v1, 0.0  ;;  %v1274_v52 = vmul.f32 %v1242_v2, %v1178_v50  ;;  %v3130_v22 = vsub.f32 %v2655_v21, %v2648_v40  ;;  %1914 = vpow2.f32 %v1157_v16 }
 0x1e0   :  { %1365 = vadd.xlane.f32.xlu0 %v1364_v27  ;;  %v3132_v36 = vsub.f32 -0.9189385, %v3131_v39  ;;  %v1243_v8 = vmul.f32 0.5, %v1179_v57  ;;  %v1244_v31 = vmul.f32 0.5, %v1180_v47  ;;  %v3134_v12 = vsub.f32 -0.9189385, %v3133_v41 }
 0x1e1   :  { %v1181_v55 = vmul.f32 %v1895_v3, %v3130_v22  ;;  %v3136_v1 = vsub.f32 -0.9189385, %v3135_v17  ;;  %v3137_v40 = vsub.f32 %v2618_v10, %v2598_v62  ;;  %v1903_v3 = vpop.eup %1902  ;;  %v775_v27 = vadd.f32 %v2284_v34, %v774_v18  ;;  %v56_v62 = vld [vmem:[%s3058_s0 + $0xd8] sm:$0xff]  ;;  %v57_v10 = vld [vmem:[%s3058_s0 + $0xe0] sm:$0xff] }
 0x1e2   :  { %v1304_v63 = vsub.f32 %v3132_v36, %v1272_v24  ;;  %v1305_v25 = vsub.f32 %v3134_v12, %v1273_v37  ;;  %v1275_v2 = vmul.f32 %v1243_v8, %v1179_v57  ;;  %v1276_v16 = vmul.f32 %v1244_v31, %v1180_v47  ;;  %v1905_v42 = vpop.eup %1904 }
 0x1e3   :  { %v1306_v7 = vsub.f32 %v3136_v1, %v1274_v52  ;;  %v1245_v50 = vmul.f32 0.5, %v1181_v55  ;;  %v1182_v21 = vmul.f32 %v2760_v38, %v3137_v40  ;;  %v3138_v24 = vsub.f32 %v2711_v0, %v2697_v61  ;;  %v1907_v47 = vpop.eup %1906 }
 0x1e4   :  { %v1367_v20 = vsel %vm1321_vm2, %v1304_v63, 0.0  ;;  %v1370_v37 = vsel %vm1321_vm2, %v1305_v25, 0.0  ;;  %v3139_v0 = vsub.f32 -0.9189385, %v2557_v44  ;;  %v3140_v18 = vsub.f32 %v2674_v4, %v2668_v6  ;;  %v1909_v41 = vpop.eup %1908 }
 0x1e5   :  { %v1183_v45 = vmul.f32 %v1899_v35, %v3138_v24  ;;  %1368 = vadd.xlane.f32.xlu1 %v1367_v20  ;;  %v1277_v52 = vmul.f32 %v1245_v50, %v1181_v55  ;;  %v1246_v22 = vmul.f32 0.5, %v1182_v21  ;;  %1371 = vadd.xlane.f32.xlu0 %v1370_v37  ;;  %v1373_v61 = vsel %vm1321_vm2, %v1306_v7, 0.0  ;;  %v784_v55 = vpop.f32.mrf.mxu1  ;;  %v1911_v13 = vpop.eup %1910  ;;  %v59_v7 = vld [vmem:[%s3058_s0 + $0xf0] sm:$0xff] }
 0x1e6   :  { %v1307_v38 = vsub.f32 %v3139_v0, %v1275_v2  ;;  %v1184_v57 = vmul.f32 %v1897_v48, %v3140_v18  ;;  %v3141_v39 = vsub.f32 -0.9189385, %v2623_v9  ;;  %v1185_v8 = vmul.f32 %v1903_v3, %v1057_v58 }
 0x1e7   :  { %v1247_v35 = vmul.f32 0.5, %v1183_v45  ;;  %v1278_v63 = vmul.f32 %v1246_v22, %v1182_v21  ;;  %v3142_v31 = vsub.f32 %v2728_v46, %v2714_v49  ;;  %v3143_v6 = vsub.f32 -0.9189385, %v2545_v51  ;;  %v58_v49 = vld [vmem:[%s3058_s0 + $0xe8] sm:$0xff] }
 0x1e8   :  { %v1309_v36 = vsub.f32 %v3141_v39, %v1277_v52  ;;  %v1376_v12 = vsel %vm1321_vm2, %v1307_v38, 0.0  ;;  %v1248_v25 = vmul.f32 0.5, %v1184_v57  ;;  %v1060_v9 = vsub.f32 %v56_v62, %v2776_v56 }
 0x1e9   :  { %v1186_v44 = vmul.f32 %v1901_v32, %v3142_v31  ;;  %v1308_v4 = vsub.f32 %v3143_v6, %v1276_v16  ;;  %v1279_v48 = vmul.f32 %v1247_v35, %v1183_v45  ;;  %v780_v17 = vadd.f32 %v2803_v23, %v2284_v34  ;;  %1374 = vadd.xlane.f32.xlu1 %v1373_v61  ;;  %v1913_v23 = vpop.eup %1912  ;;  %v3146_v45 = vld [vmem:[#allocation15_spill] sm:$0xff] }
 0x1ea   :  { %v1061_v1 = vsub.f32 %v57_v10, %v775_v27  ;;  %v1249_v29 = vmul.f32 0.5, %v1185_v8  ;;  %v785_v46 = vadd.f32 %v2284_v34, %v784_v55  ;;  %1377 = vadd.xlane.f32.xlu0 %v1376_v12  ;;  %v3144_v51 = vsub.f32 -0.9189385, %v2572_v26 }
 0x1eb   :  { %v1250_v32 = vmul.f32 0.5, %v1186_v44  ;;  %v1187_v56 = vmul.f32 %v1907_v47, %v1059_v11  ;;  %v1382_v50 = vsel %vm1321_vm2, %v1309_v36, 0.0  ;;  %v3145_v40 = vsub.f32 -0.9189385, %v2637_v5 }
 0x1ec   :  { %v1310_v58 = vsub.f32 %v3144_v51, %v1278_v63  ;;  %v1281_v3 = vmul.f32 %v1249_v29, %v1185_v8  ;;  %v1189_v20 = vmul.f32 %v1909_v41, %v1061_v1  ;;  %v1379_v26 = vsel %vm1321_vm2, %v1308_v4, 0.0  ;;  %v1915_v62 = vpop.eup %1914 }
 0x1ed   :  { %v1311_v21 = vsub.f32 %v3145_v40, %v1279_v48  ;;  %v1280_v2 = vmul.f32 %v1248_v25, %v1184_v57  ;;  %v1251_v16 = vmul.f32 0.5, %v1187_v56  ;;  %v1188_v24 = vmul.f32 %v1905_v42, %v1060_v9  ;;  %1380 = vadd.xlane.f32.xlu1 %v1379_v26  ;;  %v60_v42 = vld [vmem:[%s3058_s0 + $0xf8] sm:$0xff] }
 0x1ee   :  { %v1216_v33 = vsub.f32 -0.9189385, %v3146_v45  ;;  %v1218_v59 = vsub.f32 -0.9189385, %v2678_v14  ;;  %v1217_v11 = vsub.f32 -0.9189385, %v2690_v60  ;;  %v1062_v27 = vsub.f32 %v58_v49, %v780_v17  ;;  %1383 = vadd.xlane.f32.xlu0 %v1382_v50 }
 0x1ef   :  { %v790_v37 = vadd.f32 %v1783_v43, %v2284_v34  ;;  %v1063_v52 = vsub.f32 %v59_v7, %v785_v46  ;;  %v1385_v5 = vsel %vm1321_vm2, %v1310_v58, 0.0  ;;  %v1282_v22 = vmul.f32 %v1250_v32, %v1186_v44 }
 0x1f0   :  { %v1388_v10 = vsel %vm1321_vm2, %v1311_v21, 0.0  ;;  %v1313_v61 = vsub.f32 %v1217_v11, %v1281_v3  ;;  %v1283_v14 = vmul.f32 %v1251_v16, %v1187_v56  ;;  %v1253_v0 = vmul.f32 0.5, %v1189_v20 }
 0x1f1   :  { %v1312_v60 = vsub.f32 %v1216_v33, %v1280_v2  ;;  %v1252_v38 = vmul.f32 0.5, %v1188_v24  ;;  %v1190_v35 = vmul.f32 %v1911_v13, %v1062_v27  ;;  %v1191_v18 = vmul.f32 %v1915_v62, %v1063_v52  ;;  %1386 = vadd.xlane.f32.xlu1 %v1385_v5 }
 0x1f2   :  { %v1219_v34 = vsub.f32 -0.9189385, %v2723_v30  ;;  %v1064_v43 = vsub.f32 %v60_v42, %v790_v37  ;;  %1389 = vadd.xlane.f32.xlu0 %v1388_v10  ;;  %v1314_v57 = vsub.f32 %v1218_v59, %v1282_v22  ;;  %v1394_v47 = vsel %vm1321_vm2, %v1313_v61, 0.0 }
 0x1f3   :  { %v1285_v39 = vmul.f32 %v1253_v0, %v1189_v20  ;;  %v1255_v36 = vmul.f32 0.5, %v1191_v18  ;;  %v1391_v63 = vsel %vm1321_vm2, %v1312_v60, 0.0  ;;  %v1284_v8 = vmul.f32 %v1252_v38, %v1188_v24 }
 0x1f4   :  { %v1315_v55 = vsub.f32 %v1219_v34, %v1283_v14  ;;  %v1254_v31 = vmul.f32 0.5, %v1190_v35  ;;  %v1192_v44 = vmul.f32 %v1913_v23, %v1064_v43  ;;  %v1221_v41 = vsub.f32 -0.9189385, %v2758_v28 }
 0x1f5   :  { %1392 = vadd.xlane.f32.xlu1 %v1391_v63  ;;  %v1220_v12 = vsub.f32 -0.9189385, %v2700_v54  ;;  %v1287_v4 = vmul.f32 %v1255_v36, %v1191_v18  ;;  %v1397_v48 = vsel %vm1321_vm2, %v1314_v57, 0.0  ;;  %v1223_v1 = vsub.f32 -0.9189385, %v2807_v15 }
 0x1f6   :  { %1395 = vadd.xlane.f32.xlu0 %v1394_v47  ;;  %v1400_v30 = vsel %vm1321_vm2, %v1315_v55, 0.0  ;;  %v1317_v6 = vsub.f32 %v1221_v41, %v1285_v39  ;;  %v1286_v9 = vmul.f32 %v1254_v31, %v1190_v35  ;;  %v1256_v17 = vmul.f32 0.5, %v1192_v44 }
 0x1f7   :  { %v1316_v25 = vsub.f32 %v1220_v12, %v1284_v8  ;;  %v1222_v29 = vsub.f32 -0.9189385, %v2749_v53  ;;  %v1319_v13 = vsub.f32 %v1223_v1, %v1287_v4  ;;  %v1224_v51 = vsub.f32 -0.9189385, %v2784_v19 }
 0x1f8   :  { %v1406_v28 = vsel %vm1321_vm2, %v1317_v6, 0.0  ;;  %v1288_v46 = vmul.f32 %v1256_v17, %v1192_v44 }
 0x1f9   :  { %1398 = vadd.xlane.f32.xlu1 %v1397_v48  ;;  %v1403_v54 = vsel %vm1321_vm2, %v1316_v25, 0.0  ;;  %v1318_v49 = vsub.f32 %v1222_v29, %v1286_v9  ;;  %v1412_v58 = vsel %vm1321_vm2, %v1319_v13, 0.0 }
 0x1fa   :  { %1401 = vadd.xlane.f32.xlu0 %v1400_v30  ;;  %v1320_v15 = vsub.f32 %v1224_v51, %v1288_v46 }
 0x1fb   :  { %v1409_v32 = vsel %vm1321_vm2, %v1318_v49, 0.0 }
 0x1fc   :  { %v1415_v53 = vsel %vm1321_vm2, %v1320_v15, 0.0 }
 0x1fd   :  { %1404 = vadd.xlane.f32.xlu1 %v1403_v54 }
 0x1fe   :  { %1407 = vadd.xlane.f32.xlu0 %v1406_v28 }
 0x201   :  { %1410 = vadd.xlane.f32.xlu1 %v1409_v32 }
 0x202   :  { %1413 = vadd.xlane.f32.xlu0 %v1412_v58 }
 0x205   :  { %1416 = vadd.xlane.f32.xlu1 %v1415_v53 }
 0x235   :  { %v1327_v56 = vpop.xlane.xlu0 %1326 }
 0x236   :  { %1420 = vst.msk [vmem:[%s3059_s8 + $0x8] sm:$0xff] %vm1418_vm3, %v1327_v56 }
 0x23c   :  { %v1333_v23 = vpop.xlane.xlu1 %1332 }
 0x23d   :  { %1422 = vst.msk [vmem:[%s3059_s8 + $0x18] sm:$0xff] %vm1418_vm3, %v1333_v23 }
 0x241   :  { %v1324_v19 = vpop.xlane.xlu0 %1323 }
 0x242   :  { %1419 = vst.msk [vmem:[%s3059_s8] sm:$0xff] %vm1418_vm3, %v1324_v19 }
 0x247   :  { %v1330_v7 = vpop.xlane.xlu1 %1329 }
 0x248   :  { %1421 = vst.msk [vmem:[%s3059_s8 + $0x10] sm:$0xff] %vm1418_vm3, %v1330_v7 }
 0x24a   :  { %v1336_v50 = vpop.xlane.xlu0 %1335 }
 0x24b   :  { %1423 = vst.msk [vmem:[%s3059_s8 + $0x20] sm:$0xff] %vm1418_vm3, %v1336_v50 }
 0x24c   :  { %v1339_v40 = vpop.xlane.xlu1 %1338 }
 0x24d   :  { %1424 = vst.msk [vmem:[%s3059_s8 + $0x28] sm:$0xff] %vm1418_vm3, %v1339_v40 }
 0x24f   :  { %v1342_v21 = vpop.xlane.xlu0 %1341 }
 0x250   :  { %1425 = vst.msk [vmem:[%s3059_s8 + $0x30] sm:$0xff] %vm1418_vm3, %v1342_v21 }
 0x252   :  { %v1345_v3 = vpop.xlane.xlu1 %1344 }
 0x253   :  { %1426 = vst.msk [vmem:[%s3059_s8 + $0x38] sm:$0xff] %vm1418_vm3, %v1345_v3 }
 0x255   :  { %v1348_v20 = vpop.xlane.xlu0 %1347 }
 0x256   :  { %1427 = vst.msk [vmem:[%s3059_s8 + $0x40] sm:$0xff] %vm1418_vm3, %v1348_v20 }
 0x258   :  { %v1351_v26 = vpop.xlane.xlu1 %1350 }
 0x259   :  { %1428 = vst.msk [vmem:[%s3059_s8 + $0x48] sm:$0xff] %vm1418_vm3, %v1351_v26 }
 0x25d   :  { %v1354_v2 = vpop.xlane.xlu0 %1353 }
 0x25e   :  { %1429 = vst.msk [vmem:[%s3059_s8 + $0x50] sm:$0xff] %vm1418_vm3, %v1354_v2 }
 0x25f   :  { %v1357_v16 = vpop.xlane.xlu1 %1356 }
 0x260   :  { %1430 = vst.msk [vmem:[%s3059_s8 + $0x58] sm:$0xff] %vm1418_vm3, %v1357_v16 }
 0x261   :  { %v1360_v24 = vpop.xlane.xlu0 %1359 }
 0x262   :  { %1431 = vst.msk [vmem:[%s3059_s8 + $0x60] sm:$0xff] %vm1418_vm3, %v1360_v24 }
 0x268   :  { %v1363_v45 = vpop.xlane.xlu1 %1362 }
 0x269   :  { %1432 = vst.msk [vmem:[%s3059_s8 + $0x68] sm:$0xff] %vm1418_vm3, %v1363_v45  ;;  %v1366_v33 = vpop.xlane.xlu0 %1365 }
 0x26a   :  { %1433 = vst.msk [vmem:[%s3059_s8 + $0x70] sm:$0xff] %vm1418_vm3, %v1366_v33 }
 0x26e   :  { %v1369_v59 = vpop.xlane.xlu1 %1368  ;;  %v1372_v11 = vpop.xlane.xlu0 %1371 }
 0x26f   :  { %1434 = vst.msk [vmem:[%s3059_s8 + $0x78] sm:$0xff] %vm1418_vm3, %v1369_v59  ;;  %1435 = vst.msk [vmem:[%s3059_s8 + $0x80] sm:$0xff] %vm1418_vm3, %v1372_v11 }
 0x272   :  { %v1375_v27 = vpop.xlane.xlu1 %1374 }
 0x273   :  { %1436 = vst.msk [vmem:[%s3059_s8 + $0x88] sm:$0xff] %vm1418_vm3, %v1375_v27  ;;  %v1378_v37 = vpop.xlane.xlu0 %1377 }
 0x274   :  { %1437 = vst.msk [vmem:[%s3059_s8 + $0x90] sm:$0xff] %vm1418_vm3, %v1378_v37 }
 0x276   :  { %v1381_v52 = vpop.xlane.xlu1 %1380 }
 0x277   :  { %1438 = vst.msk [vmem:[%s3059_s8 + $0x98] sm:$0xff] %vm1418_vm3, %v1381_v52  ;;  %v1384_v5 = vpop.xlane.xlu0 %1383 }
 0x278   :  { %1439 = vst.msk [vmem:[%s3059_s8 + $0xa0] sm:$0xff] %vm1418_vm3, %v1384_v5 }
 0x27a   :  { %v1387_v22 = vpop.xlane.xlu1 %1386 }
 0x27b   :  { %1440 = vst.msk [vmem:[%s3059_s8 + $0xa8] sm:$0xff] %vm1418_vm3, %v1387_v22  ;;  %v1390_v62 = vpop.xlane.xlu0 %1389 }
 0x27c   :  { %1441 = vst.msk [vmem:[%s3059_s8 + $0xb0] sm:$0xff] %vm1418_vm3, %v1390_v62 }
 0x27e   :  { %v1393_v42 = vpop.xlane.xlu1 %1392 }
 0x27f   :  { %1442 = vst.msk [vmem:[%s3059_s8 + $0xb8] sm:$0xff] %vm1418_vm3, %v1393_v42  ;;  %v1396_v10 = vpop.xlane.xlu0 %1395 }
 0x280   :  { %1443 = vst.msk [vmem:[%s3059_s8 + $0xc0] sm:$0xff] %vm1418_vm3, %v1396_v10 }
 0x282   :  { %v1399_v61 = vpop.xlane.xlu1 %1398 }
 0x283   :  { %1444 = vst.msk [vmem:[%s3059_s8 + $0xc8] sm:$0xff] %vm1418_vm3, %v1399_v61  ;;  %v1402_v14 = vpop.xlane.xlu0 %1401 }
 0x284   :  { %1445 = vst.msk [vmem:[%s3059_s8 + $0xd0] sm:$0xff] %vm1418_vm3, %v1402_v14 }
 0x286   :  { %v1405_v0 = vpop.xlane.xlu1 %1404 }
 0x287   :  { %1446 = vst.msk [vmem:[%s3059_s8 + $0xd8] sm:$0xff] %vm1418_vm3, %v1405_v0  ;;  %v1408_v60 = vpop.xlane.xlu0 %1407 }
 0x288   :  { %1447 = vst.msk [vmem:[%s3059_s8 + $0xe0] sm:$0xff] %vm1418_vm3, %v1408_v60 }
 0x28a   :  { %v1411_v38 = vpop.xlane.xlu1 %1410 }
 0x28b   :  { %1448 = vst.msk [vmem:[%s3059_s8 + $0xe8] sm:$0xff] %vm1418_vm3, %v1411_v38  ;;  %v1414_v35 = vpop.xlane.xlu0 %1413 }
 0x28c   :  { %1449 = vst.msk [vmem:[%s3059_s8 + $0xf0] sm:$0xff] %vm1418_vm3, %v1414_v35 }
 0x28e   :  { %v1417_v18 = vpop.xlane.xlu1 %1416 }
 0x28f   :  { %1450 = vst.msk [vmem:[%s3059_s8 + $0xf8] sm:$0xff] %vm1418_vm3, %v1417_v18 }

</bundles_post_ra>
